<compile_context>
chip_gen: v6e
topology: v6e:2x2x1
jax: 0.10.0
libtpu: 0.0.40
codegen_flags: <defaults>
</compile_context>

<pallas_src>
import functools

import jax
import jax.numpy as jnp
from jax.experimental import pallas as pl
from jax.experimental.pallas import tpu as pltpu


# Fixed architecture hard-coded by the PyTorch module's nn.Sequential layers
# (the cv*_out / cv*_k / ... ctor kwargs are ignored by the original code):
#   C1: Conv1d(1->3,  k=3, s=1)+ReLU   P1: MaxPool1d(k=3, s=1)
#   C2: Conv1d(3->5,  k=5, s=1)+ReLU   P2: MaxPool1d(k=3, s=2)
#   C3: Conv1d(5->8,  k=3, s=2)+ReLU   P3: MaxPool1d(k=5, s=2)
#   C4: Conv1d(8->12, k=5, s=2)+ReLU   P4: MaxPool1d(k=5, s=2)
#   out: Linear(12*2 -> 1) + Sigmoid
_CONV_CFG = [(1, 3, 3, 1), (3, 5, 5, 1), (5, 8, 3, 2), (8, 12, 5, 2)]  # (cin, cout, k, s)
_POOL_CFG = [(3, 1), (3, 2), (5, 2), (5, 2)]                            # (k, s)


def _out_len(l_in, k, s):
    return (l_in - k) // s + 1


# --------------------------------------------------------------------------------------
# One-time parameter prep (NOT on the per-call path).
# --------------------------------------------------------------------------------------
def prepare_params(params, batch_size):
    """Build kron/block-diag conv weights (transposed), tiled biases, head weights and a
    batch group-sum matrix, packed into ONE f32 [rows, ncols] buffer.  Returns
    (packed_array, offsets) where offsets[name] = (row0, rows, cols) static ints."""
    (w1, b1), (w2, b2), (w3, b3), (w4, b4), (wl, bl) = params
    convs = [(w1, b1), (w2, b2), (w3, b3), (w4, b4)]
    eye = jnp.eye(batch_size, dtype=jnp.float32)

    pieces = []
    for i, ((cin, cout, k, _s), (w, b)) in enumerate(zip(_CONV_CFG, convs)):
        w = jnp.asarray(w, jnp.float32)
        assert w.shape == (cout, cin, k)
        for t in range(k):
            # [B*cin, B*cout] block-diag: one MXU matmul per tap covers every batch row.
            pieces.append((f"w{i}_{t}", jnp.kron(eye, w[:, :, t].T)))
        pieces.append((f"b{i}",
                       jnp.tile(jnp.asarray(b, jnp.float32), batch_size)[None, :]))
    wl_rs = jnp.reshape(jnp.asarray(wl, jnp.float32), (12, 2))           # [12(chan), 2(len)]
    pieces.append(("wlt", jnp.tile(wl_rs.T, (1, batch_size))))           # [2, B*12]
    pieces.append(("gb", jnp.kron(eye, jnp.ones((12, 1), jnp.float32))))  # [B*12, B]
    pieces.append(("bl", jnp.reshape(jnp.asarray(bl, jnp.float32), (1, 1))))

    ncols = max(int(p.shape[1]) for _, p in pieces)
    offsets, rows, padded = {}, 0, []
    for name, p in pieces:
        r, c = int(p.shape[0]), int(p.shape[1])
        offsets[name] = (rows, r, c)
        rpad = (-r) % 8                                  # sublane-align every section
        padded.append(jnp.pad(p, ((0, rpad), (0, ncols - c))))
        rows += r + rpad
    packed = jnp.concatenate(padded, axis=0)
    return jax.device_put(packed), offsets


# --------------------------------------------------------------------------------------
# The fused kernel.  Activations are [L, B*C]: sequence on sublanes, channels on lanes.
# --------------------------------------------------------------------------------------
def _disc_kernel(x_ref, p_ref, out_ref, *scratch, off):
    def get(name):
        r0, r, c = off[name]
        return p_ref[r0:r0 + r, 0:c]                    # static slice of packed params

    def slice_rows(src, t, l_out, s):
        if s == 1:
            return src[t:t + l_out, :]                  # contiguous slice of a value
        # stride>1: src is a VMEM scratch ref -> hardware sublane-strided read
        return src[pl.ds(t, l_out, stride=s), :]

    def conv_relu(src, i, k, s):
        l_out = (src.shape[0] - k) // s + 1
        acc = jnp.dot(slice_rows(src, 0, l_out, s), get(f"w{i}_0"),
                      preferred_element_type=jnp.float32)
        # TODO(synk): on v5e the k per-tap dots could be fused into one matmul by
        # lane-concatenating the tap slices; skipped (review notes the copies may eat it).
        for t in range(1, k):
            acc = acc + jnp.dot(slice_rows(src, t, l_out, s), get(f"w{i}_{t}"),
                                preferred_element_type=jnp.float32)
        return jnp.maximum(acc + get(f"b{i}"), 0.0)

    def maxpool(src, k, s):
        l_out = (src.shape[0] - k) // s + 1
        z = slice_rows(src, 0, l_out, s)
        for t in range(1, k):
            z = jnp.maximum(z, slice_rows(src, t, l_out, s))
        return z

    scratch_it = iter(scratch)
    a = x_ref[...]                                       # [L, B]
    for i, ((_ci, _co, k, s), (pk, ps)) in enumerate(zip(_CONV_CFG, _POOL_CFG)):
        if s > 1:                                        # strided conv: stage input in VMEM
            sref = next(scratch_it)
            sref[...] = a
            a = conv_relu(sref, i, k, s)
        else:
            a = conv_relu(a, i, k, s)
        if ps > 1:                                       # strided pool: stage input in VMEM
            sref = next(scratch_it)
            sref[...] = a
            a = maxpool(sref, pk, ps)
        else:
            a = maxpool(a, pk, ps)

    # Head: flatten([B,12,2]) @ wl^T + bl, sigmoid.   a is [2, B*12].
    weighted = a * get("wlt")                            # [2, B*12] elementwise (VPU)
    v = weighted[0:1, :] + weighted[1:2, :]              # [1, B*12]  (no lane reduce)
    logits = jnp.dot(v, get("gb"), preferred_element_type=jnp.float32) + get("bl")
    out_ref[...] = 1.0 / (1.0 + jnp.exp(-logits))        # [1, B] lane-dense writeback


# --------------------------------------------------------------------------------------
# Wrapper factory (shapes/offsets are static; prep arrays are passed in, never rebuilt).
# --------------------------------------------------------------------------------------
def make_discriminator(offsets, *, batch_size, seq_length, n_features=1):
    assert n_features == 1, "kernel layout assumes n_features == 1 (as in the module)"

    # Static plan: final length must be 2 (Linear(12*2, 1)); collect scratch shapes for
    # every stride-2 stage input and an accurate FLOP count.
    scratch_shapes = []
    flops = 0
    l = seq_length
    for (cin, cout, k, s), (pk, ps) in zip(_CONV_CFG, _POOL_CFG):
        if s > 1:
            scratch_shapes.append((l, batch_size * cin))
        lo = _out_len(l, k, s)
        flops += 2 * k * lo * (batch_size * cin) * (batch_size * cout)
        if ps > 1:
            scratch_shapes.append((lo, batch_size * cout))
        l = _out_len(lo, pk, ps)
    assert l == 2, f"seq_length={seq_length} gives final length {l}; Linear expects 2"
    flops += 2 * batch_size * 12 * 2 + 2 * (batch_size * 12) * batch_size

    kernel = functools.partial(_disc_kernel, off=offsets)
    vmem = pl.BlockSpec(memory_space=pltpu.MemorySpace.VMEM)

    def forward(x, packed_params):
        # Single tiny transpose: sequence onto sublanes, batch onto lanes.
        x_t = jnp.transpose(x.reshape(batch_size, seq_length).astype(jnp.float32))
        out = pl.pallas_call(
            kernel,
            out_shape=jax.ShapeDtypeStruct((1, batch_size), jnp.float32),
            in_specs=[vmem, vmem],                       # no grid -> no pipeline machinery
            out_specs=vmem,
            scratch_shapes=[pltpu.VMEM(s, jnp.float32) for s in scratch_shapes],
            cost_estimate=pl.CostEstimate(
                flops=int(flops),
                transcendentals=int(batch_size),
                bytes_accessed=int(4 * (batch_size * seq_length
                                        + int(packed_params.size) + batch_size))),
        )(x_t, packed_params)
        return out.reshape(batch_size, 1)

    return jax.jit(forward)


# --------------------------------------------------------------------------------------
# Pure-JAX reference mirroring the PyTorch forward exactly.
# --------------------------------------------------------------------------------------
def _reference(x, params, *, batch_size, seq_length, n_features=1):
    (w1, b1), (w2, b2), (w3, b3), (w4, b4), (wl, bl) = params
    a = x.reshape(batch_size, n_features, seq_length)

    def conv(a, w, b, s):
        y = jax.lax.conv_general_dilated(a, w, window_strides=(s,), padding="VALID",
                                         dimension_numbers=("NCH", "OIH", "NCH"))
        return jax.nn.relu(y + b[None, :, None])

    def pool(a, k, s):
        return jax.lax.reduce_window(a, -jnp.inf, jax.lax.max,
                                     window_dimensions=(1, 1, k),
                                     window_strides=(1, 1, s), padding="VALID")

    a = pool(conv(a, w1, b1, 1), 3, 1)
    a = pool(conv(a, w2, b2, 1), 3, 2)
    a = pool(conv(a, w3, b3, 2), 5, 2)
    a = pool(conv(a, w4, b4, 2), 5, 2)
    a = a.reshape(batch_size, -1)
    return jax.nn.sigmoid(a @ wl.T + bl)


if __name__ == "__main__":
    key = jax.random.PRNGKey(0)
    batch_size, n_features, seq_length = 4, 1, 160  # 160 -> final length 2 (Linear(12*2, 1))

    k_x, k_p = jax.random.split(key)
    ks = jax.random.split(k_p, 10)

    def conv_init(kw, kb, cout, cin, ksz):
        lim = 1.0 / float(jnp.sqrt(jnp.float32(cin * ksz)))
        w = jax.random.uniform(kw, (cout, cin, ksz), jnp.float32, -lim, lim)
        b = jax.random.uniform(kb, (cout,), jnp.float32, -lim, lim)
        return w, b

    params = [
        conv_init(ks[0], ks[1], 3, 1, 3),
        conv_init(ks[2], ks[3], 5, 3, 5),
        conv_init(ks[4], ks[5], 8, 5, 3),
        conv_init(ks[6], ks[7], 12, 8, 5),
    ]
    lim = 1.0 / float(jnp.sqrt(jnp.float32(24)))
    wl = jax.random.uniform(ks[8], (1, 24), jnp.float32, -lim, lim)
    bl = jax.random.uniform(ks[9], (1,), jnp.float32, -lim, lim)
    params.append((wl, bl))

    x = jax.random.normal(k_x, (batch_size, n_features, seq_length), dtype=jnp.float32)

    # One-time prep, then the cheap per-call forward.
    packed, offsets = prepare_params(params, batch_size)
    forward = make_discriminator(offsets, batch_size=batch_size, seq_length=seq_length,
                                 n_features=n_features)

    out = forward(x, packed)
    out = jax.block_until_ready(out)

    ref = _reference(x, params, batch_size=batch_size, seq_length=seq_length)
    assert out.shape == (batch_size, 1)
    assert jnp.allclose(out, ref, atol=1e-4, rtol=1e-4), "mismatch vs reference"

    print("KERNEL_OK")
</pallas_src>

<mosaic_0001>
module attributes {stable_mosaic.version = 11 : i64} {
  func.func @_disc_kernel(%arg0: memref<160x4xf32, #tpu.memory_space<vmem>>, %arg1: memref<432x48xf32, #tpu.memory_space<vmem>>, %arg2: memref<1x4xf32, #tpu.memory_space<vmem>>, %arg3: memref<152x20xf32, #tpu.memory_space<vmem>>, %arg4: memref<75x20xf32, #tpu.memory_space<vmem>>, %arg5: memref<37x32xf32, #tpu.memory_space<vmem>>, %arg6: memref<17x32xf32, #tpu.memory_space<vmem>>, %arg7: memref<7x48xf32, #tpu.memory_space<vmem>>) attributes {dimension_semantics = [], scalar_prefetch = 0 : i64, scratch_operands = 5 : i64, tpu.core_type = #tpu.core_type<tc>} {
    %c0 = arith.constant 0 : index
    %c0_0 = arith.constant 0 : index
    %0 = vector.load %arg0[%c0, %c0_0] : memref<160x4xf32, #tpu.memory_space<vmem>>, vector<160x4xf32>
    %1 = vector.extract_strided_slice %0 {offsets = [0, 0], sizes = [158, 4], strides = [1, 1]} : vector<160x4xf32> to vector<158x4xf32>
    %c0_1 = arith.constant 0 : index
    %c0_2 = arith.constant 0 : index
    %2 = vector.load %arg1[%c0_1, %c0_2] : memref<432x48xf32, #tpu.memory_space<vmem>>, vector<4x12xf32>
    %cst = arith.constant dense<0.000000e+00> : vector<158x12xf32>
    %3 = tpu.matmul %1, %2, %cst {dimension_numbers = #tpu.dot_dimension_numbers<[1], [0], [0], [1], [0, 0, 1, 1], [], []>} : vector<158x4xf32>, vector<4x12xf32>, vector<158x12xf32> -> vector<158x12xf32>
    %4 = vector.extract_strided_slice %0 {offsets = [1, 0], sizes = [158, 4], strides = [1, 1]} : vector<160x4xf32> to vector<158x4xf32>
    %c8 = arith.constant 8 : index
    %c0_3 = arith.constant 0 : index
    %5 = vector.load %arg1[%c8, %c0_3] : memref<432x48xf32, #tpu.memory_space<vmem>>, vector<4x12xf32>
    %cst_4 = arith.constant dense<0.000000e+00> : vector<158x12xf32>
    %6 = tpu.matmul %4, %5, %cst_4 {dimension_numbers = #tpu.dot_dimension_numbers<[1], [0], [0], [1], [0, 0, 1, 1], [], []>} : vector<158x4xf32>, vector<4x12xf32>, vector<158x12xf32> -> vector<158x12xf32>
    %7 = arith.addf %3, %6 : vector<158x12xf32>
    %8 = vector.extract_strided_slice %0 {offsets = [2, 0], sizes = [158, 4], strides = [1, 1]} : vector<160x4xf32> to vector<158x4xf32>
    %c16 = arith.constant 16 : index
    %c0_5 = arith.constant 0 : index
    %9 = vector.load %arg1[%c16, %c0_5] : memref<432x48xf32, #tpu.memory_space<vmem>>, vector<4x12xf32>
    %cst_6 = arith.constant dense<0.000000e+00> : vector<158x12xf32>
    %10 = tpu.matmul %8, %9, %cst_6 {dimension_numbers = #tpu.dot_dimension_numbers<[1], [0], [0], [1], [0, 0, 1, 1], [], []>} : vector<158x4xf32>, vector<4x12xf32>, vector<158x12xf32> -> vector<158x12xf32>
    %11 = arith.addf %7, %10 : vector<158x12xf32>
    %c24 = arith.constant 24 : index
    %c0_7 = arith.constant 0 : index
    %12 = vector.load %arg1[%c24, %c0_7] : memref<432x48xf32, #tpu.memory_space<vmem>>, vector<1x12xf32>
    %13 = vector.broadcast %12 : vector<1x12xf32> to vector<158x12xf32>
    %14 = arith.addf %11, %13 : vector<158x12xf32>
    %cst_8 = arith.constant 0.000000e+00 : f32
    %15 = vector.broadcast %cst_8 : f32 to vector<158x12xf32>
    %16 = arith.maximumf %14, %15 : vector<158x12xf32>
    %17 = vector.extract_strided_slice %16 {offsets = [0, 0], sizes = [156, 12], strides = [1, 1]} : vector<158x12xf32> to vector<156x12xf32>
    %18 = vector.extract_strided_slice %16 {offsets = [1, 0], sizes = [156, 12], strides = [1, 1]} : vector<158x12xf32> to vector<156x12xf32>
    %19 = arith.maximumf %17, %18 : vector<156x12xf32>
    %20 = vector.extract_strided_slice %16 {offsets = [2, 0], sizes = [156, 12], strides = [1, 1]} : vector<158x12xf32> to vector<156x12xf32>
    %21 = arith.maximumf %19, %20 : vector<156x12xf32>
    %22 = vector.extract_strided_slice %21 {offsets = [0, 0], sizes = [152, 12], strides = [1, 1]} : vector<156x12xf32> to vector<152x12xf32>
    %c32 = arith.constant 32 : index
    %c0_9 = arith.constant 0 : index
    %23 = vector.load %arg1[%c32, %c0_9] : memref<432x48xf32, #tpu.memory_space<vmem>>, vector<12x20xf32>
    %cst_10 = arith.constant dense<0.000000e+00> : vector<152x20xf32>
    %24 = tpu.matmul %22, %23, %cst_10 {dimension_numbers = #tpu.dot_dimension_numbers<[1], [0], [0], [1], [0, 0, 1, 1], [], []>} : vector<152x12xf32>, vector<12x20xf32>, vector<152x20xf32> -> vector<152x20xf32>
    %25 = vector.extract_strided_slice %21 {offsets = [1, 0], sizes = [152, 12], strides = [1, 1]} : vector<156x12xf32> to vector<152x12xf32>
    %c48 = arith.constant 48 : index
    %c0_11 = arith.constant 0 : index
    %26 = vector.load %arg1[%c48, %c0_11] : memref<432x48xf32, #tpu.memory_space<vmem>>, vector<12x20xf32>
    %cst_12 = arith.constant dense<0.000000e+00> : vector<152x20xf32>
    %27 = tpu.matmul %25, %26, %cst_12 {dimension_numbers = #tpu.dot_dimension_numbers<[1], [0], [0], [1], [0, 0, 1, 1], [], []>} : vector<152x12xf32>, vector<12x20xf32>, vector<152x20xf32> -> vector<152x20xf32>
    %28 = arith.addf %24, %27 : vector<152x20xf32>
    %29 = vector.extract_strided_slice %21 {offsets = [2, 0], sizes = [152, 12], strides = [1, 1]} : vector<156x12xf32> to vector<152x12xf32>
    %c64 = arith.constant 64 : index
    %c0_13 = arith.constant 0 : index
    %30 = vector.load %arg1[%c64, %c0_13] : memref<432x48xf32, #tpu.memory_space<vmem>>, vector<12x20xf32>
    %cst_14 = arith.constant dense<0.000000e+00> : vector<152x20xf32>
    %31 = tpu.matmul %29, %30, %cst_14 {dimension_numbers = #tpu.dot_dimension_numbers<[1], [0], [0], [1], [0, 0, 1, 1], [], []>} : vector<152x12xf32>, vector<12x20xf32>, vector<152x20xf32> -> vector<152x20xf32>
    %32 = arith.addf %28, %31 : vector<152x20xf32>
    %33 = vector.extract_strided_slice %21 {offsets = [3, 0], sizes = [152, 12], strides = [1, 1]} : vector<156x12xf32> to vector<152x12xf32>
    %c80 = arith.constant 80 : index
    %c0_15 = arith.constant 0 : index
    %34 = vector.load %arg1[%c80, %c0_15] : memref<432x48xf32, #tpu.memory_space<vmem>>, vector<12x20xf32>
    %cst_16 = arith.constant dense<0.000000e+00> : vector<152x20xf32>
    %35 = tpu.matmul %33, %34, %cst_16 {dimension_numbers = #tpu.dot_dimension_numbers<[1], [0], [0], [1], [0, 0, 1, 1], [], []>} : vector<152x12xf32>, vector<12x20xf32>, vector<152x20xf32> -> vector<152x20xf32>
    %36 = arith.addf %32, %35 : vector<152x20xf32>
    %37 = vector.extract_strided_slice %21 {offsets = [4, 0], sizes = [152, 12], strides = [1, 1]} : vector<156x12xf32> to vector<152x12xf32>
    %c96 = arith.constant 96 : index
    %c0_17 = arith.constant 0 : index
    %38 = vector.load %arg1[%c96, %c0_17] : memref<432x48xf32, #tpu.memory_space<vmem>>, vector<12x20xf32>
    %cst_18 = arith.constant dense<0.000000e+00> : vector<152x20xf32>
    %39 = tpu.matmul %37, %38, %cst_18 {dimension_numbers = #tpu.dot_dimension_numbers<[1], [0], [0], [1], [0, 0, 1, 1], [], []>} : vector<152x12xf32>, vector<12x20xf32>, vector<152x20xf32> -> vector<152x20xf32>
    %40 = arith.addf %36, %39 : vector<152x20xf32>
    %c112 = arith.constant 112 : index
    %c0_19 = arith.constant 0 : index
    %41 = vector.load %arg1[%c112, %c0_19] : memref<432x48xf32, #tpu.memory_space<vmem>>, vector<1x20xf32>
    %42 = vector.broadcast %41 : vector<1x20xf32> to vector<152x20xf32>
    %43 = arith.addf %40, %42 : vector<152x20xf32>
    %cst_20 = arith.constant 0.000000e+00 : f32
    %44 = vector.broadcast %cst_20 : f32 to vector<152x20xf32>
    %45 = arith.maximumf %43, %44 : vector<152x20xf32>
    %c0_21 = arith.constant 0 : index
    %c0_22 = arith.constant 0 : index
    %46 = vector.load %arg3[%c0_21, %c0_22] : memref<152x20xf32, #tpu.memory_space<vmem>>, vector<152x20xf32>
    tpu.vector_store %arg3[%c0_21, %c0_22], %45 {strides = array<i32>} : memref<152x20xf32, #tpu.memory_space<vmem>>, vector<152x20xf32>,
    %c0_23 = arith.constant 0 : index
    %c0_24 = arith.constant 0 : index
    %47 = tpu.strided_load %arg3[%c0_23, %c0_24] {strides = array<i32: 2, 1>} : memref<152x20xf32, #tpu.memory_space<vmem>>, vector<75x20xf32>
    %c1 = arith.constant 1 : index
    %c0_25 = arith.constant 0 : index
    %48 = tpu.strided_load %arg3[%c1, %c0_25] {strides = array<i32: 2, 1>} : memref<152x20xf32, #tpu.memory_space<vmem>>, vector<75x20xf32>
    %49 = arith.maximumf %47, %48 : vector<75x20xf32>
    %c2 = arith.constant 2 : index
    %c0_26 = arith.constant 0 : index
    %50 = tpu.strided_load %arg3[%c2, %c0_26] {strides = array<i32: 2, 1>} : memref<152x20xf32, #tpu.memory_space<vmem>>, vector<75x20xf32>
    %51 = arith.maximumf %49, %50 : vector<75x20xf32>
    %c0_27 = arith.constant 0 : index
    %c0_28 = arith.constant 0 : index
    %52 = vector.load %arg4[%c0_27, %c0_28] : memref<75x20xf32, #tpu.memory_space<vmem>>, vector<75x20xf32>
    tpu.vector_store %arg4[%c0_27, %c0_28], %51 {strides = array<i32>} : memref<75x20xf32, #tpu.memory_space<vmem>>, vector<75x20xf32>,
    %c0_29 = arith.constant 0 : index
    %c0_30 = arith.constant 0 : index
    %53 = tpu.strided_load %arg4[%c0_29, %c0_30] {strides = array<i32: 2, 1>} : memref<75x20xf32, #tpu.memory_space<vmem>>, vector<37x20xf32>
    %c120 = arith.constant 120 : index
    %c0_31 = arith.constant 0 : index
    %54 = vector.load %arg1[%c120, %c0_31] : memref<432x48xf32, #tpu.memory_space<vmem>>, vector<20x32xf32>
    %cst_32 = arith.constant dense<0.000000e+00> : vector<37x32xf32>
    %55 = tpu.matmul %53, %54, %cst_32 {dimension_numbers = #tpu.dot_dimension_numbers<[1], [0], [0], [1], [0, 0, 1, 1], [], []>} : vector<37x20xf32>, vector<20x32xf32>, vector<37x32xf32> -> vector<37x32xf32>
    %c1_33 = arith.constant 1 : index
    %c0_34 = arith.constant 0 : index
    %56 = tpu.strided_load %arg4[%c1_33, %c0_34] {strides = array<i32: 2, 1>} : memref<75x20xf32, #tpu.memory_space<vmem>>, vector<37x20xf32>
    %c144 = arith.constant 144 : index
    %c0_35 = arith.constant 0 : index
    %57 = vector.load %arg1[%c144, %c0_35] : memref<432x48xf32, #tpu.memory_space<vmem>>, vector<20x32xf32>
    %cst_36 = arith.constant dense<0.000000e+00> : vector<37x32xf32>
    %58 = tpu.matmul %56, %57, %cst_36 {dimension_numbers = #tpu.dot_dimension_numbers<[1], [0], [0], [1], [0, 0, 1, 1], [], []>} : vector<37x20xf32>, vector<20x32xf32>, vector<37x32xf32> -> vector<37x32xf32>
    %59 = arith.addf %55, %58 : vector<37x32xf32>
    %c2_37 = arith.constant 2 : index
    %c0_38 = arith.constant 0 : index
    %60 = tpu.strided_load %arg4[%c2_37, %c0_38] {strides = array<i32: 2, 1>} : memref<75x20xf32, #tpu.memory_space<vmem>>, vector<37x20xf32>
    %c168 = arith.constant 168 : index
    %c0_39 = arith.constant 0 : index
    %61 = vector.load %arg1[%c168, %c0_39] : memref<432x48xf32, #tpu.memory_space<vmem>>, vector<20x32xf32>
    %cst_40 = arith.constant dense<0.000000e+00> : vector<37x32xf32>
    %62 = tpu.matmul %60, %61, %cst_40 {dimension_numbers = #tpu.dot_dimension_numbers<[1], [0], [0], [1], [0, 0, 1, 1], [], []>} : vector<37x20xf32>, vector<20x32xf32>, vector<37x32xf32> -> vector<37x32xf32>
    %63 = arith.addf %59, %62 : vector<37x32xf32>
    %c192 = arith.constant 192 : index
    %c0_41 = arith.constant 0 : index
    %64 = vector.load %arg1[%c192, %c0_41] : memref<432x48xf32, #tpu.memory_space<vmem>>, vector<1x32xf32>
    %65 = vector.broadcast %64 : vector<1x32xf32> to vector<37x32xf32>
    %66 = arith.addf %63, %65 : vector<37x32xf32>
    %cst_42 = arith.constant 0.000000e+00 : f32
    %67 = vector.broadcast %cst_42 : f32 to vector<37x32xf32>
    %68 = arith.maximumf %66, %67 : vector<37x32xf32>
    %c0_43 = arith.constant 0 : index
    %c0_44 = arith.constant 0 : index
    %69 = vector.load %arg5[%c0_43, %c0_44] : memref<37x32xf32, #tpu.memory_space<vmem>>, vector<37x32xf32>
    tpu.vector_store %arg5[%c0_43, %c0_44], %68 {strides = array<i32>} : memref<37x32xf32, #tpu.memory_space<vmem>>, vector<37x32xf32>,
    %c0_45 = arith.constant 0 : index
    %c0_46 = arith.constant 0 : index
    %70 = tpu.strided_load %arg5[%c0_45, %c0_46] {strides = array<i32: 2, 1>} : memref<37x32xf32, #tpu.memory_space<vmem>>, vector<17x32xf32>
    %c1_47 = arith.constant 1 : index
    %c0_48 = arith.constant 0 : index
    %71 = tpu.strided_load %arg5[%c1_47, %c0_48] {strides = array<i32: 2, 1>} : memref<37x32xf32, #tpu.memory_space<vmem>>, vector<17x32xf32>
    %72 = arith.maximumf %70, %71 : vector<17x32xf32>
    %c2_49 = arith.constant 2 : index
    %c0_50 = arith.constant 0 : index
    %73 = tpu.strided_load %arg5[%c2_49, %c0_50] {strides = array<i32: 2, 1>} : memref<37x32xf32, #tpu.memory_space<vmem>>, vector<17x32xf32>
    %74 = arith.maximumf %72, %73 : vector<17x32xf32>
    %c3 = arith.constant 3 : index
    %c0_51 = arith.constant 0 : index
    %75 = tpu.strided_load %arg5[%c3, %c0_51] {strides = array<i32: 2, 1>} : memref<37x32xf32, #tpu.memory_space<vmem>>, vector<17x32xf32>
    %76 = arith.maximumf %74, %75 : vector<17x32xf32>
    %c4 = arith.constant 4 : index
    %c0_52 = arith.constant 0 : index
    %77 = tpu.strided_load %arg5[%c4, %c0_52] {strides = array<i32: 2, 1>} : memref<37x32xf32, #tpu.memory_space<vmem>>, vector<17x32xf32>
    %78 = arith.maximumf %76, %77 : vector<17x32xf32>
    %c0_53 = arith.constant 0 : index
    %c0_54 = arith.constant 0 : index
    %79 = vector.load %arg6[%c0_53, %c0_54] : memref<17x32xf32, #tpu.memory_space<vmem>>, vector<17x32xf32>
    tpu.vector_store %arg6[%c0_53, %c0_54], %78 {strides = array<i32>} : memref<17x32xf32, #tpu.memory_space<vmem>>, vector<17x32xf32>,
    %c0_55 = arith.constant 0 : index
    %c0_56 = arith.constant 0 : index
    %80 = tpu.strided_load %arg6[%c0_55, %c0_56] {strides = array<i32: 2, 1>} : memref<17x32xf32, #tpu.memory_space<vmem>>, vector<7x32xf32>
    %c200 = arith.constant 200 : index
    %c0_57 = arith.constant 0 : index
    %81 = vector.load %arg1[%c200, %c0_57] : memref<432x48xf32, #tpu.memory_space<vmem>>, vector<32x48xf32>
    %cst_58 = arith.constant dense<0.000000e+00> : vector<7x48xf32>
    %82 = tpu.matmul %80, %81, %cst_58 {dimension_numbers = #tpu.dot_dimension_numbers<[1], [0], [0], [1], [0, 0, 1, 1], [], []>} : vector<7x32xf32>, vector<32x48xf32>, vector<7x48xf32> -> vector<7x48xf32>
    %c1_59 = arith.constant 1 : index
    %c0_60 = arith.constant 0 : index
    %83 = tpu.strided_load %arg6[%c1_59, %c0_60] {strides = array<i32: 2, 1>} : memref<17x32xf32, #tpu.memory_space<vmem>>, vector<7x32xf32>
    %c232 = arith.constant 232 : index
    %c0_61 = arith.constant 0 : index
    %84 = vector.load %arg1[%c232, %c0_61] : memref<432x48xf32, #tpu.memory_space<vmem>>, vector<32x48xf32>
    %cst_62 = arith.constant dense<0.000000e+00> : vector<7x48xf32>
    %85 = tpu.matmul %83, %84, %cst_62 {dimension_numbers = #tpu.dot_dimension_numbers<[1], [0], [0], [1], [0, 0, 1, 1], [], []>} : vector<7x32xf32>, vector<32x48xf32>, vector<7x48xf32> -> vector<7x48xf32>
    %86 = arith.addf %82, %85 : vector<7x48xf32>
    %c2_63 = arith.constant 2 : index
    %c0_64 = arith.constant 0 : index
    %87 = tpu.strided_load %arg6[%c2_63, %c0_64] {strides = array<i32: 2, 1>} : memref<17x32xf32, #tpu.memory_space<vmem>>, vector<7x32xf32>
    %c264 = arith.constant 264 : index
    %c0_65 = arith.constant 0 : index
    %88 = vector.load %arg1[%c264, %c0_65] : memref<432x48xf32, #tpu.memory_space<vmem>>, vector<32x48xf32>
    %cst_66 = arith.constant dense<0.000000e+00> : vector<7x48xf32>
    %89 = tpu.matmul %87, %88, %cst_66 {dimension_numbers = #tpu.dot_dimension_numbers<[1], [0], [0], [1], [0, 0, 1, 1], [], []>} : vector<7x32xf32>, vector<32x48xf32>, vector<7x48xf32> -> vector<7x48xf32>
    %90 = arith.addf %86, %89 : vector<7x48xf32>
    %c3_67 = arith.constant 3 : index
    %c0_68 = arith.constant 0 : index
    %91 = tpu.strided_load %arg6[%c3_67, %c0_68] {strides = array<i32: 2, 1>} : memref<17x32xf32, #tpu.memory_space<vmem>>, vector<7x32xf32>
    %c296 = arith.constant 296 : index
    %c0_69 = arith.constant 0 : index
    %92 = vector.load %arg1[%c296, %c0_69] : memref<432x48xf32, #tpu.memory_space<vmem>>, vector<32x48xf32>
    %cst_70 = arith.constant dense<0.000000e+00> : vector<7x48xf32>
    %93 = tpu.matmul %91, %92, %cst_70 {dimension_numbers = #tpu.dot_dimension_numbers<[1], [0], [0], [1], [0, 0, 1, 1], [], []>} : vector<7x32xf32>, vector<32x48xf32>, vector<7x48xf32> -> vector<7x48xf32>
    %94 = arith.addf %90, %93 : vector<7x48xf32>
    %c4_71 = arith.constant 4 : index
    %c0_72 = arith.constant 0 : index
    %95 = tpu.strided_load %arg6[%c4_71, %c0_72] {strides = array<i32: 2, 1>} : memref<17x32xf32, #tpu.memory_space<vmem>>, vector<7x32xf32>
    %c328 = arith.constant 328 : index
    %c0_73 = arith.constant 0 : index
    %96 = vector.load %arg1[%c328, %c0_73] : memref<432x48xf32, #tpu.memory_space<vmem>>, vector<32x48xf32>
    %cst_74 = arith.constant dense<0.000000e+00> : vector<7x48xf32>
    %97 = tpu.matmul %95, %96, %cst_74 {dimension_numbers = #tpu.dot_dimension_numbers<[1], [0], [0], [1], [0, 0, 1, 1], [], []>} : vector<7x32xf32>, vector<32x48xf32>, vector<7x48xf32> -> vector<7x48xf32>
    %98 = arith.addf %94, %97 : vector<7x48xf32>
    %c360 = arith.constant 360 : index
    %c0_75 = arith.constant 0 : index
    %99 = vector.load %arg1[%c360, %c0_75] : memref<432x48xf32, #tpu.memory_space<vmem>>, vector<1x48xf32>
    %100 = vector.broadcast %99 : vector<1x48xf32> to vector<7x48xf32>
    %101 = arith.addf %98, %100 : vector<7x48xf32>
    %cst_76 = arith.constant 0.000000e+00 : f32
    %102 = vector.broadcast %cst_76 : f32 to vector<7x48xf32>
    %103 = arith.maximumf %101, %102 : vector<7x48xf32>
    %c0_77 = arith.constant 0 : index
    %c0_78 = arith.constant 0 : index
    %104 = vector.load %arg7[%c0_77, %c0_78] : memref<7x48xf32, #tpu.memory_space<vmem>>, vector<7x48xf32>
    tpu.vector_store %arg7[%c0_77, %c0_78], %103 {strides = array<i32>} : memref<7x48xf32, #tpu.memory_space<vmem>>, vector<7x48xf32>,
    %c0_79 = arith.constant 0 : index
    %c0_80 = arith.constant 0 : index
    %105 = tpu.strided_load %arg7[%c0_79, %c0_80] {strides = array<i32: 2, 1>} : memref<7x48xf32, #tpu.memory_space<vmem>>, vector<2x48xf32>
    %c1_81 = arith.constant 1 : index
    %c0_82 = arith.constant 0 : index
    %106 = tpu.strided_load %arg7[%c1_81, %c0_82] {strides = array<i32: 2, 1>} : memref<7x48xf32, #tpu.memory_space<vmem>>, vector<2x48xf32>
    %107 = arith.maximumf %105, %106 : vector<2x48xf32>
    %c2_83 = arith.constant 2 : index
    %c0_84 = arith.constant 0 : index
    %108 = tpu.strided_load %arg7[%c2_83, %c0_84] {strides = array<i32: 2, 1>} : memref<7x48xf32, #tpu.memory_space<vmem>>, vector<2x48xf32>
    %109 = arith.maximumf %107, %108 : vector<2x48xf32>
    %c3_85 = arith.constant 3 : index
    %c0_86 = arith.constant 0 : index
    %110 = tpu.strided_load %arg7[%c3_85, %c0_86] {strides = array<i32: 2, 1>} : memref<7x48xf32, #tpu.memory_space<vmem>>, vector<2x48xf32>
    %111 = arith.maximumf %109, %110 : vector<2x48xf32>
    %c4_87 = arith.constant 4 : index
    %c0_88 = arith.constant 0 : index
    %112 = tpu.strided_load %arg7[%c4_87, %c0_88] {strides = array<i32: 2, 1>} : memref<7x48xf32, #tpu.memory_space<vmem>>, vector<2x48xf32>
    %113 = arith.maximumf %111, %112 : vector<2x48xf32>
    %c368 = arith.constant 368 : index
    %c0_89 = arith.constant 0 : index
    %114 = vector.load %arg1[%c368, %c0_89] : memref<432x48xf32, #tpu.memory_space<vmem>>, vector<2x48xf32>
    %115 = arith.mulf %113, %114 : vector<2x48xf32>
    %116 = vector.extract_strided_slice %115 {offsets = [0, 0], sizes = [1, 48], strides = [1, 1]} : vector<2x48xf32> to vector<1x48xf32>
    %117 = vector.extract_strided_slice %115 {offsets = [1, 0], sizes = [1, 48], strides = [1, 1]} : vector<2x48xf32> to vector<1x48xf32>
    %118 = arith.addf %116, %117 : vector<1x48xf32>
    %c376 = arith.constant 376 : index
    %c0_90 = arith.constant 0 : index
    %119 = vector.load %arg1[%c376, %c0_90] : memref<432x48xf32, #tpu.memory_space<vmem>>, vector<48x4xf32>
    %cst_91 = arith.constant dense<0.000000e+00> : vector<1x4xf32>
    %120 = tpu.matmul %118, %119, %cst_91 {dimension_numbers = #tpu.dot_dimension_numbers<[1], [0], [0], [1], [0, 0, 1, 1], [], []>} : vector<1x48xf32>, vector<48x4xf32>, vector<1x4xf32> -> vector<1x4xf32>
    %c424 = arith.constant 424 : index
    %c0_92 = arith.constant 0 : index
    %121 = vector.load %arg1[%c424, %c0_92] : memref<432x48xf32, #tpu.memory_space<vmem>>, vector<1x1xf32>
    %122 = vector.broadcast %121 : vector<1x1xf32> to vector<1x4xf32>
    %123 = arith.addf %120, %122 : vector<1x4xf32>
    %cst_93 = arith.constant 0.000000e+00 : f32
    %124 = vector.broadcast %cst_93 : f32 to vector<1x4xf32>
    %125 = arith.subf %124, %123 : vector<1x4xf32>
    %126 = math.exp %125 : vector<1x4xf32>
    %cst_94 = arith.constant 1.000000e+00 : f32
    %127 = vector.broadcast %cst_94 : f32 to vector<1x4xf32>
    %128 = arith.addf %127, %126 : vector<1x4xf32>
    %cst_95 = arith.constant 1.000000e+00 : f32
    %129 = vector.broadcast %cst_95 : f32 to vector<1x4xf32>
    %130 = arith.divf %129, %128 : vector<1x4xf32>
    %c0_96 = arith.constant 0 : index
    %c0_97 = arith.constant 0 : index
    %131 = vector.load %arg2[%c0_96, %c0_97] : memref<1x4xf32, #tpu.memory_space<vmem>>, vector<1x4xf32>
    tpu.vector_store %arg2[%c0_96, %c0_97], %130 {strides = array<i32>} : memref<1x4xf32, #tpu.memory_space<vmem>>, vector<1x4xf32>,
    return
  }
}

</mosaic_0001>

<bundles_post_ra>
// kernel: forward.1
= control target key start
LH: loop header
LB: loop body
LE: loop exit
PB: predicated region body
PF: predicated region fallthrough
CT: control target
= control target key end

     0   :  { %vm135_vm0 = vcmask 1043456   ;;  %vm54_vm1 = vcmask 1046528   ;;  %vm94_vm2 = vcmask 31744   ;;  %s6022_s0 = inlined_call_operand.vmem [shape: f32[160,4], index: 0, kind: input, shape index: {}]   ;;  %s6023_s1 = inlined_call_operand.vmem [shape: f32[432,48], index: 1, kind: input, shape index: {}]   ;;  %s6024_s2 = inlined_call_operand.hbm [shape: f32[1,4], index: 2, kind: output, shape index: {}]  }
   0x1   :  { %v33_v0 = vld [vmem:[%s6023_s1 + $0x8] sm:$0xf]  ;;  %v32_v1 = vld [vmem:[%s6023_s1] sm:$0xf]  ;;  %v512_v5 = vld [vmem:[%s6023_s1 + $0x10] sm:$0xf] }
   0x2   :  { %v4382_v2 = vld [vmem:[%s6022_s0] sm:$0xff]  ;;  %3789 = vmatprep.subr.msk.mxu0 %vm135_vm0, %v33_v0  ;;  %3821 = vmatprep.subr.msk.mxu1 %vm135_vm0, %v32_v1  ;;  %v4389_v3 = vld [vmem:[%s6022_s0 + $0x8] sm:$0xff]  ;;  %v4401_v7 = vld [vmem:[%s6022_s0 + $0x10] sm:$0xff] }
   0x3   :  { %v55_v4 = vrot.slane %v4382_v2, 1  ;;  %3790 = vmatpush3.msk.msra.mxu0 %vm135_vm0, %v33_v0  ;;  %v56_v6 = vrot.slane %v4389_v3, 1  ;;  %3822 = vmatpush3.msk.msra.mxu1 %vm135_vm0, %v32_v1  ;;  %v4406_v8 = vld [vmem:[%s6022_s0 + $0x18] sm:$0xff]  ;;  %v4411_v9 = vld [vmem:[%s6022_s0 + $0x20] sm:$0xff]  ;;  %v58_v10 = vrot.slane %v4401_v7, 1  ;;  %v4422_v13 = vld [vmem:[%s6022_s0 + $0x28] sm:$0xff] }
   0x4   :  { %3823 = vmatprep.mubr.msk.f32.mxu1 %vm94_vm2, %v4382_v2  ;;  %3853 = vmatprep.subr.msk.mxu0 %vm135_vm0, %v512_v5  ;;  %v60_v11 = vrot.slane %v4406_v8, 1  ;;  %v62_v12 = vrot.slane %v4411_v9, 1  ;;  %v64_v15 = vrot.slane %v4422_v13, 1  ;;  %v4431_v16 = vld [vmem:[%s6022_s0 + $0x30] sm:$0xff]  ;;  %v4441_v19 = vld [vmem:[%s6022_s0 + $0x38] sm:$0xff]  ;;  %v4455_v24 = vld [vmem:[%s6022_s0 + $0x40] sm:$0xff] }
   0x5   :  { %v57_v14 = vsel %vm54_vm1, %v55_v4, %v56_v6  ;;  %3824 = vmatmul.mubr.msk.f32.vlgmr.msra.gmra.mxu1 %vm94_vm2, %v4389_v3  ;;  %v59_v17 = vsel %vm54_vm1, %v56_v6, %v58_v10  ;;  %v66_v21 = vrot.slane %v4431_v16, 1  ;;  %v68_v23 = vrot.slane %v4441_v19, 1 }
   0x6   :  { %3791 = vmatprep.mubr.msk.f32.mxu0 %vm94_vm2, %v57_v14  ;;  %v61_v18 = vsel %vm54_vm1, %v58_v10, %v60_v11  ;;  %3826 = vmatprep.mubr.msk.f32.mxu1 %vm94_vm2, %v4401_v7  ;;  %v63_v20 = vsel %vm54_vm1, %v60_v11, %v62_v12  ;;  %v65_v22 = vsel %vm54_vm1, %v62_v12, %v64_v15 }
   0x7   :  { %3792 = vmatmul.mubr.msk.f32.vlgmr.msra.gmra.mxu0 %vm94_vm2, %v59_v17 }
   0x8   :  { %3854 = vmatpush3.msk.msra.mxu0 %vm135_vm0, %v512_v5  ;;  %3794 = vmatprep.mubr.msk.f32.mxu0 %vm94_vm2, %v61_v18 }
   0x9   :  { %3827 = vmatmul.mubr.msk.f32.gmra.mxu1 %vm94_vm2, %v4406_v8 }
   0xa   :  { %7 = vsyncpa [#allocation8], 0  ;;  %3829 = vmatprep.mubr.msk.f32.mxu1 %vm94_vm2, %v4411_v9  ;;  %v4462_v25 = vld [vmem:[%s6022_s0 + $0x48] sm:$0xff]  ;;  %v67_v26 = vsel %vm54_vm1, %v64_v15, %v66_v21  ;;  %v70_v27 = vrot.slane %v4455_v24, 1  ;;  %v69_v28 = vsel %vm54_vm1, %v66_v21, %v68_v23  ;;  %v4475_v30 = vld [vmem:[%s6022_s0 + $0x50] sm:$0xff]  ;;  %v514_v62 = vrot.slane %v4382_v2, 2 }
   0xb   :  { %3795 = vmatmul.mubr.msk.f32.gmra.mxu0 %vm94_vm2, %v63_v20  ;;  %v72_v29 = vrot.slane %v4462_v25, 1  ;;  %v4482_v31 = vld [vmem:[%s6022_s0 + $0x58] sm:$0xff]  ;;  %v74_v33 = vrot.slane %v4475_v30, 1  ;;  %v4495_v36 = vld [vmem:[%s6022_s0 + $0x60] sm:$0xff]  ;;  %v4502_v37 = vld [vmem:[%s6022_s0 + $0x68] sm:$0xff]  ;;  %v515_v63 = vrot.slane %v4389_v3, 2 }
   0xc   :  { %3797 = vmatprep.mubr.msk.f32.mxu0 %vm94_vm2, %v65_v22  ;;  %v71_v32 = vsel %vm54_vm1, %v68_v23, %v70_v27  ;;  %v76_v35 = vrot.slane %v4482_v31, 1  ;;  %v78_v39 = vrot.slane %v4495_v36, 1  ;;  %v80_v41 = vrot.slane %v4502_v37, 1  ;;  %v4515_v42 = vld [vmem:[%s6022_s0 + $0x70] sm:$0xff]  ;;  %v4522_v43 = vld [vmem:[%s6022_s0 + $0x78] sm:$0xff]  ;;  %v4535_v48 = vld [vmem:[%s6022_s0 + $0x80] sm:$0xff] }
   0xd   :  { %3830 = vmatmul.mubr.msk.f32.gmra.mxu1 %vm94_vm2, %v4422_v13  ;;  %v73_v34 = vsel %vm54_vm1, %v70_v27, %v72_v29  ;;  %v75_v38 = vsel %vm54_vm1, %v72_v29, %v74_v33  ;;  %v82_v45 = vrot.slane %v4515_v42, 1  ;;  %v84_v47 = vrot.slane %v4522_v43, 1  ;;  %v4542_v49 = vld [vmem:[%s6022_s0 + $0x88] sm:$0xff]  ;;  %v4555_v54 = vld [vmem:[%s6022_s0 + $0x90] sm:$0xff]  ;;  %v4562_v55 = vld [vmem:[%s6022_s0 + $0x98] sm:$0xff]  ;;  %s4357_s13 = smov [#allocation7]  }
   0xe   :  { %3832 = vmatprep.mubr.msk.f32.mxu1 %vm94_vm2, %v4431_v16  ;;  %v77_v40 = vsel %vm54_vm1, %v74_v33, %v76_v35  ;;  %v79_v44 = vsel %vm54_vm1, %v76_v35, %v78_v39  ;;  %v81_v46 = vsel %vm54_vm1, %v78_v39, %v80_v41  ;;  %v86_v51 = vrot.slane %v4535_v48, 1  ;;  %v1006_v39 = vld [vmem:[%s6023_s1 + $0x30] sm:$0xff]  ;;  %s3366_s14 = sshll.u32 %s4357_s13, 4  ;;  %s3367_s14 = int_to_ptr.vmem [resolvable:$true] %s3366_s14 }
   0xf   :  { %3798 = vmatmul.mubr.msk.f32.gmra.mxu0 %vm94_vm2, %v67_v26  ;;  %v83_v50 = vsel %vm54_vm1, %v80_v41, %v82_v45  ;;  %v85_v52 = vsel %vm54_vm1, %v82_v45, %v84_v47  ;;  %v88_v53 = vrot.slane %v4542_v49, 1  ;;  %v90_v57 = vrot.slane %v4555_v54, 1  ;;  %v1004_v41 = vld [vmem:[%s6023_s1 + $0x20] sm:$0xff]  ;;  %s4336_s15 = scalar_lea.vmem %s3367_s14, 32  ;;  %p4337_p1 = scmp.lt.s32.totalorder %s3367_s14, %s3367_s14 }
  0x10   :  { %3800 = vmatprep.mubr.msk.f32.mxu0 %vm94_vm2, %v69_v28  ;;  %v87_v56 = vsel %vm54_vm1, %v84_v47, %v86_v51  ;;  %v92_v59 = vrot.slane %v4562_v55, 1  ;;  %vm513_vm3 = vcmask 1045504   ;;  %v517_v0 = vrot.slane %v4401_v7, 2 }
  0x11   :  { %3833 = vmatmul.mubr.msk.f32.gmra.mxu1 %vm94_vm2, %v4441_v19  ;;  %v89_v58 = vsel %vm54_vm1, %v86_v51, %v88_v53  ;;  %v91_v60 = vsel %vm54_vm1, %v88_v53, %v90_v57  ;;  %v516_v1 = vsel %vm513_vm3, %v514_v62, %v515_v63  ;;  %v519_v4 = vrot.slane %v4406_v8, 2 }
  0x12   :  { %3835 = vmatprep.mubr.msk.f32.mxu1 %vm94_vm2, %v4455_v24  ;;  %v93_v61 = vsel %vm54_vm1, %v90_v57, %v92_v59  ;;  %v518_v2 = vsel %vm513_vm3, %v515_v63, %v517_v0  ;;  %v521_v3 = vrot.slane %v4411_v9, 2  ;;  %v523_v6 = vrot.slane %v4422_v13, 2 }
  0x13   :  { %3801 = vmatmul.mubr.msk.f32.gmra.mxu0 %vm94_vm2, %v71_v32  ;;  %v520_v5 = vsel %vm513_vm3, %v517_v0, %v519_v4  ;;  %v525_v8 = vrot.slane %v4431_v16, 2  ;;  %v527_v11 = vrot.slane %v4441_v19, 2  ;;  %v529_v12 = vrot.slane %v4455_v24, 2 }
  0x14   :  { %3803 = vmatprep.mubr.msk.f32.mxu0 %vm94_vm2, %v73_v34  ;;  %v522_v7 = vsel %vm513_vm3, %v519_v4, %v521_v3  ;;  %v524_v10 = vsel %vm513_vm3, %v521_v3, %v523_v6  ;;  %v531_v14 = vrot.slane %v4462_v25, 2  ;;  %v533_v16 = vrot.slane %v4475_v30, 2 }
  0x15   :  { %3836 = vmatmul.mubr.msk.f32.gmra.mxu1 %vm94_vm2, %v4462_v25  ;;  %v526_v9 = vsel %vm513_vm3, %v523_v6, %v525_v8  ;;  %v528_v13 = vsel %vm513_vm3, %v525_v8, %v527_v11  ;;  %v530_v15 = vsel %vm513_vm3, %v527_v11, %v529_v12  ;;  %v535_v18 = vrot.slane %v4482_v31, 2 }
  0x16   :  { %3838 = vmatprep.mubr.msk.f32.mxu1 %vm94_vm2, %v4475_v30  ;;  %v532_v17 = vsel %vm513_vm3, %v529_v12, %v531_v14  ;;  %v534_v19 = vsel %vm513_vm3, %v531_v14, %v533_v16  ;;  %v537_v20 = vrot.slane %v4495_v36, 2  ;;  %v539_v22 = vrot.slane %v4502_v37, 2 }
  0x17   :  { %3804 = vmatmul.mubr.msk.f32.gmra.mxu0 %vm94_vm2, %v75_v38  ;;  %v536_v21 = vsel %vm513_vm3, %v533_v16, %v535_v18  ;;  %v541_v24 = vrot.slane %v4515_v42, 2  ;;  %v543_v26 = vrot.slane %v4522_v43, 2  ;;  %v545_v28 = vrot.slane %v4535_v48, 2 }
  0x18   :  { %3806 = vmatprep.mubr.msk.f32.mxu0 %vm94_vm2, %v77_v40  ;;  %v538_v23 = vsel %vm513_vm3, %v535_v18, %v537_v20  ;;  %v540_v25 = vsel %vm513_vm3, %v537_v20, %v539_v22  ;;  %v547_v30 = vrot.slane %v4542_v49, 2  ;;  %v549_v32 = vrot.slane %v4555_v54, 2  ;;  %v1005_v40 = vld [vmem:[%s6023_s1 + $0x28] sm:$0xf] }
  0x19   :  { %3839 = vmatmul.mubr.msk.f32.gmra.mxu1 %vm94_vm2, %v4482_v31  ;;  %v542_v27 = vsel %vm513_vm3, %v539_v22, %v541_v24  ;;  %v544_v29 = vsel %vm513_vm3, %v541_v24, %v543_v26  ;;  %v546_v31 = vsel %vm513_vm3, %v543_v26, %v545_v28  ;;  %v551_v34 = vrot.slane %v4562_v55, 2 }
  0x1a   :  { %3841 = vmatprep.mubr.msk.f32.mxu1 %vm94_vm2, %v4495_v36  ;;  %v548_v33 = vsel %vm513_vm3, %v545_v28, %v547_v30  ;;  %v550_v35 = vsel %vm513_vm3, %v547_v30, %v549_v32  ;;  %v6025_v38 = vmov 0.0   ;;  %vm4355_vm4 = vmmov 0  }
  0x1b   :  { %3807 = vmatmul.mubr.msk.f32.gmra.mxu0 %vm94_vm2, %v79_v44  ;;  %v552_v36 = vsel %vm513_vm3, %v549_v32, %v551_v34  ;;  %3885 = vmatprep.subr.mxu1 %v6025_v38  ;;  %vm1067_vm5 = vcmask 97280   ;;  %vm1733_vm6 = vcmask 1044480   ;;  %vm2297_vm7 = vcmask 162816  }
  0x1c   :  { %3809 = vmatprep.mubr.msk.f32.mxu0 %vm94_vm2, %v81_v46  ;;  %3946 = vmatprep.subr.mxu0 %v6025_v38  ;;  %vm2405_vm8 = vcmask 157696   ;;  %vm2789_vm9 = vcmask 261120   ;;  %vm2794_vm10 = vcmask 258048   ;;  %vm2839_vm11 = vcmask 253952  }
  0x1d   :  { %3842 = vmatmul.mubr.msk.f32.gmra.mxu1 %vm94_vm2, %v4502_v37  ;;  %v1007_v37 = vld [vmem:[%s6023_s1 + $0x38] sm:$0xf]  ;;  %vm3245_vm12 = vcmask 391168   ;;  %vm3278_vm13 = vcmask 392192   ;;  %vm3358_vm14 = vcmask 24576  }
  0x1e   :  { %3844 = vmatprep.mubr.msk.f32.mxu1 %vm94_vm2, %v4515_v42  ;;  %3886 = vmatpush3.msk.msra.mxu1 %vm135_vm0, %v1007_v37 }
  0x1f   :  { %3810 = vmatmul.mubr.msk.f32.gmra.mxu0 %vm94_vm2, %v83_v50  ;;  %3887 = vmatprep.subr.mxu1 %v6025_v38 }
  0x20   :  { %3812 = vmatprep.mubr.msk.f32.mxu0 %vm94_vm2, %v85_v52  ;;  %3888 = vmatpush3.msra.mxu1 %v1006_v39 }
  0x21   :  { %3845 = vmatmul.mubr.msk.f32.gmra.mxu1 %vm94_vm2, %v4522_v43  ;;  %4007 = vmatprep.subr.mxu1 %v6025_v38 }
  0x22   :  { %3847 = vmatprep.mubr.msk.f32.mxu1 %vm94_vm2, %v4535_v48 }
  0x23   :  { %3813 = vmatmul.mubr.msk.f32.gmra.mxu0 %vm94_vm2, %v87_v56 }
  0x24   :  { %3815 = vmatprep.mubr.msk.f32.mxu0 %vm94_vm2, %v89_v58 }
  0x25   :  { %3848 = vmatmul.mubr.msk.f32.gmra.mxu1 %vm94_vm2, %v4542_v49 }
  0x26   :  { %3850 = vmatprep.mubr.msk.f32.mxu1 %vm94_vm2, %v4555_v54 }
  0x27   :  { %3816 = vmatmul.mubr.msk.f32.gmra.mxu0 %vm94_vm2, %v91_v60 }
  0x28   :  { %3818 = vmatprep.mubr.msk.f32.mxu0 %vm94_vm2, %v93_v61 }
  0x29   :  { %3851 = vmatmul.mubr.msk.f32.gmra.mxu1 %vm94_vm2, %v4562_v55 }
  0x2a   :  { %3889 = vmatprep.mubr.msk.f32.mxu1 %vm4355_vm4, %v6025_v38 }
  0x2b   :  { %3819 = vmatmul.mubr.msk.f32.gmra.mxu0 %vm94_vm2, %v92_v59 }
  0x2c   :  { %3855 = vmatprep.mubr.msk.f32.mxu0 %vm94_vm2, %v516_v1 }
  0x2f   :  { %3856 = vmatmul.mubr.msk.f32.vlgmr.msra.gmra.mxu0 %vm94_vm2, %v518_v2 }
  0x30   :  { %3858 = vmatprep.mubr.msk.f32.mxu0 %vm94_vm2, %v520_v5  ;;  %3947 = vmatpush3.msk.msra.mxu0 %vm135_vm0, %v1005_v40 }
  0x31   :  { %3948 = vmatprep.subr.mxu0 %v6025_v38 }
  0x32   :  { %3949 = vmatpush3.msra.mxu0 %v1004_v41 }
  0x33   :  { %3859 = vmatmul.mubr.msk.f32.gmra.mxu0 %vm94_vm2, %v522_v7  ;;  %4068 = vmatprep.subr.mxu0 %v6025_v38 }
  0x34   :  { %3861 = vmatprep.mubr.msk.f32.mxu0 %vm94_vm2, %v524_v10 }
  0x37   :  { %3862 = vmatmul.mubr.msk.f32.gmra.mxu0 %vm94_vm2, %v526_v9 }
  0x38   :  { %3864 = vmatprep.mubr.msk.f32.mxu0 %vm94_vm2, %v528_v13 }
  0x3b   :  { %3865 = vmatmul.mubr.msk.f32.gmra.mxu0 %vm94_vm2, %v530_v15 }
  0x3c   :  { %3867 = vmatprep.mubr.msk.f32.mxu0 %vm94_vm2, %v532_v17  ;;  %v4675_v17 = vld [vmem:[%s6023_s1 + $0x18] ss:$0 sm:$0xff] }
  0x3f   :  { %3868 = vmatmul.mubr.msk.f32.gmra.mxu0 %vm94_vm2, %v534_v19 }
  0x40   :  { %3870 = vmatprep.mubr.msk.f32.mxu0 %vm94_vm2, %v536_v21 }
  0x43   :  { %3871 = vmatmul.mubr.msk.f32.gmra.mxu0 %vm94_vm2, %v538_v23 }
  0x44   :  { %3873 = vmatprep.mubr.msk.f32.mxu0 %vm94_vm2, %v540_v25 }
  0x47   :  { %3874 = vmatmul.mubr.msk.f32.gmra.mxu0 %vm94_vm2, %v542_v27 }
  0x48   :  { %3876 = vmatprep.mubr.msk.f32.mxu0 %vm94_vm2, %v544_v29 }
  0x4b   :  { %3877 = vmatmul.mubr.msk.f32.gmra.mxu0 %vm94_vm2, %v546_v31 }
  0x4c   :  { %3879 = vmatprep.mubr.msk.f32.mxu0 %vm94_vm2, %v548_v33 }
  0x4f   :  { %3880 = vmatmul.mubr.msk.f32.gmra.mxu0 %vm94_vm2, %v550_v35 }
  0x50   :  { %3882 = vmatprep.mubr.msk.f32.mxu0 %vm94_vm2, %v552_v36 }
  0x53   :  { %3883 = vmatmul.mubr.msk.f32.gmra.mxu0 %vm94_vm2, %v551_v34 }
  0x54   :  { %3950 = vmatprep.mubr.msk.f32.mxu0 %vm4355_vm4, %v6025_v38 }
  0xc5   :  { %v3825_v42 = vpop.f32.mrf.mxu1 }
  0xc7   :  { %v3793_v43 = vpop.f32.mrf.mxu0  ;;  %v413_v44 = vpop.f32.mrf.mxu1 }
  0xc8   :  { %v419_v14 = vadd.f32 %v3825_v42, %v3793_v43 }
  0xc9   :  { %v205_v45 = vpop.f32.mrf.mxu0  ;;  %v3828_v46 = vpop.f32.mrf.mxu1 }
  0xca   :  { %v414_v18 = vadd.f32 %v413_v44, %v205_v45 }
  0xcb   :  { %v3796_v47 = vpop.f32.mrf.mxu0  ;;  %v423_v48 = vpop.f32.mrf.mxu1 }
  0xcc   :  { %v429_v21 = vadd.f32 %v3828_v46, %v3796_v47 }
  0xcd   :  { %v215_v49 = vpop.f32.mrf.mxu0  ;;  %v3831_v50 = vpop.f32.mrf.mxu1 }
  0xce   :  { %v424_v24 = vadd.f32 %v423_v48, %v215_v49 }
  0xcf   :  { %v3799_v51 = vpop.f32.mrf.mxu0  ;;  %v433_v52 = vpop.f32.mrf.mxu1 }
  0xd0   :  { %v439_v25 = vadd.f32 %v3831_v50, %v3799_v51 }
  0xd1   :  { %v225_v53 = vpop.f32.mrf.mxu0  ;;  %v3834_v54 = vpop.f32.mrf.mxu1 }
  0xd2   :  { %v434_v28 = vadd.f32 %v433_v52, %v225_v53 }
  0xd3   :  { %v3802_v55 = vpop.f32.mrf.mxu0  ;;  %v443_v56 = vpop.f32.mrf.mxu1 }
  0xd4   :  { %v449_v32 = vadd.f32 %v3834_v54, %v3802_v55 }
  0xd5   :  { %v235_v57 = vpop.f32.mrf.mxu0  ;;  %v3837_v58 = vpop.f32.mrf.mxu1 }
  0xd6   :  { %v444_v33 = vadd.f32 %v443_v56, %v235_v57 }
  0xd7   :  { %v3805_v59 = vpop.f32.mrf.mxu0  ;;  %v453_v60 = vpop.f32.mrf.mxu1 }
  0xd8   :  { %v459_v34 = vadd.f32 %v3837_v58, %v3805_v59 }
  0xd9   :  { %v245_v61 = vpop.f32.mrf.mxu0  ;;  %v3840_v62 = vpop.f32.mrf.mxu1 }
  0xda   :  { %v4681_v35 = vadd.f32 %v453_v60, %v245_v61 }
  0xdb   :  { %v3808_v63 = vpop.f32.mrf.mxu0  ;;  %v463_v0 = vpop.f32.mrf.mxu1 }
  0xdc   :  { %v4683_v37 = vadd.f32 %v3840_v62, %v3808_v63 }
  0xdd   :  { %v255_v1 = vpop.f32.mrf.mxu0  ;;  %v3843_v2 = vpop.f32.mrf.mxu1 }
  0xde   :  { %v4685_v39 = vadd.f32 %v463_v0, %v255_v1 }
  0xdf   :  { %v3811_v4 = vpop.f32.mrf.mxu0  ;;  %v473_v5 = vpop.f32.mrf.mxu1 }
  0xe0   :  { %v4688_v42 = vadd.f32 %v3843_v2, %v3811_v4 }
  0xe1   :  { %v265_v3 = vpop.f32.mrf.mxu0  ;;  %v3846_v8 = vpop.f32.mrf.mxu1 }
  0xe2   :  { %v4690_v43 = vadd.f32 %v473_v5, %v265_v3 }
  0xe3   :  { %v3814_v6 = vpop.f32.mrf.mxu0  ;;  %v483_v9 = vpop.f32.mrf.mxu1 }
  0xe4   :  { %v4695_v52 = vadd.f32 %v3846_v8, %v3814_v6 }
  0xe5   :  { %v275_v7 = vpop.f32.mrf.mxu0  ;;  %v3849_v15 = vpop.f32.mrf.mxu1 }
  0xe6   :  { %v4697_v53 = vadd.f32 %v483_v9, %v275_v7 }
  0xe7   :  { %v3817_v10 = vpop.f32.mrf.mxu0  ;;  %v493_v26 = vpop.f32.mrf.mxu1 }
  0xe8   :  { %v4699_v54 = vadd.f32 %v3849_v15, %v3817_v10 }
  0xe9   :  { %v285_v11 = vpop.f32.mrf.mxu0  ;;  %v3852_v44 = vpop.f32.mrf.mxu1 }
  0xea   :  { %v4702_v57 = vadd.f32 %v493_v26, %v285_v11 }
  0xeb   :  { %v3820_v12 = vpop.f32.mrf.mxu0  ;;  %v503_v61 = vpop.f32.mrf.mxu1 }
  0xec   :  { %v4704_v58 = vadd.f32 %v3852_v44, %v3820_v12  ;;  %v1732_v12 = vld [vmem:[%s6023_s1 + $0x58] sm:$0xf] }
  0xed   :  { %v4670_v13 = vpop.f32.mrf.mxu0 }
  0xef   :  { %v3857_v16 = vpop.f32.mrf.mxu0 }
  0xf0   :  { %v762_v19 = vadd.f32 %v3857_v16, %v419_v14  ;;  %v4720_v14 = vadd.f32 %v503_v61, %v4670_v13  ;;  %v1731_v13 = vld [vmem:[%s6023_s1 + $0x50] sm:$0xff] }
  0xf1   :  { %v662_v20 = vpop.f32.mrf.mxu0 }
  0xf2   :  { %v787_v22 = vadd.f32 %v4675_v17, %v762_v19  ;;  %v761_v23 = vadd.f32 %v662_v20, %v414_v18 }
  0xf3   :  { %v3860_v27 = vpop.f32.mrf.mxu0 }
  0xf4   :  { %v4678_v29 = vmax.f32 %v787_v22, 0.0  ;;  %v786_v30 = vadd.f32 %v4675_v17, %v761_v23  ;;  %v764_v31 = vadd.f32 %v3860_v27, %v429_v21 }
  0xf5   :  { %v672_v36 = vpop.f32.mrf.mxu0 }
  0xf6   :  { %v806_v40 = vmax.f32 %v786_v30, 0.0  ;;  %v789_v41 = vadd.f32 %v4675_v17, %v764_v31  ;;  %v847_v45 = vrot.slane %v4678_v29, 1  ;;  %v763_v46 = vadd.f32 %v672_v36, %v424_v24 }
  0xf7   :  { %v3863_v47 = vpop.f32.mrf.mxu0  ;;  %v926_v59 = vrot.slane %v4678_v29, 2 }
  0xf8   :  { %v846_v48 = vrot.slane %v806_v40, 1  ;;  %v925_v49 = vrot.slane %v806_v40, 2  ;;  %v4693_v50 = vmax.f32 %v789_v41, 0.0  ;;  %v766_v51 = vadd.f32 %v3863_v47, %v439_v25 }
  0xf9   :  { %v788_v55 = vadd.f32 %v4675_v17, %v763_v46  ;;  %v682_v56 = vpop.f32.mrf.mxu0 }
  0xfa   :  { %v848_v60 = vsel %vm54_vm1, %v846_v48, %v847_v45  ;;  %v791_v0 = vadd.f32 %v4675_v17, %v766_v51  ;;  %v765_v1 = vadd.f32 %v682_v56, %v434_v28  ;;  %v927_v2 = vsel %vm513_vm3, %v925_v49, %v926_v59 }
  0xfb   :  { %v905_v62 = vmax.f32 %v806_v40, %v848_v60  ;;  %v808_v63 = vmax.f32 %v788_v55, 0.0  ;;  %v3866_v4 = vpop.f32.mrf.mxu0  ;;  %v851_v3 = vrot.slane %v4693_v50, 1  ;;  %v930_v5 = vrot.slane %v4693_v50, 2 }
  0xfc   :  { %v768_v6 = vadd.f32 %v3866_v4, %v449_v32  ;;  %v4714_v11 = vmax.f32 %v791_v0, 0.0  ;;  %v790_v15 = vadd.f32 %v4675_v17, %v765_v1 }
  0xfd   :  { %v4712_v7 = vmax.f32 %v905_v62, %v927_v2  ;;  %v849_v8 = vrot.slane %v808_v63, 1  ;;  %v928_v10 = vrot.slane %v808_v63, 2  ;;  %v692_v9 = vpop.f32.mrf.mxu0 }
  0xfe   :  { %v793_v16 = vadd.f32 %v4675_v17, %v768_v6  ;;  %v767_v18 = vadd.f32 %v692_v9, %v444_v33  ;;  %v855_v22 = vrot.slane %v4714_v11, 1  ;;  %v934_v25 = vrot.slane %v4714_v11, 2 }
  0xff   :  { %v850_v19 = vsel %vm54_vm1, %v847_v45, %v849_v8  ;;  %v852_v20 = vsel %vm54_vm1, %v849_v8, %v851_v3  ;;  %v931_v21 = vsel %vm513_vm3, %v928_v10, %v930_v5  ;;  %v3869_v23 = vpop.f32.mrf.mxu0  ;;  %3951 = vmatmul.mubr.msk.f32.vlgmr.msra.gmra.mxu0 %vm1067_vm5, %v4712_v7  ;;  %v4736_v26 = vmax.f32 %v790_v15, 0.0 }
 0x100   :  { %v907_v24 = vmax.f32 %v808_v63, %v852_v20  ;;  %v4738_v27 = vmax.f32 %v793_v16, 0.0  ;;  %3953 = vmatprep.mubr.msk.f32.mxu0 %vm4355_vm4, %v6025_v38  ;;  %4069 = vmatpush3.msk.msra.mxu0 %vm135_vm0, %v1732_v12  ;;  %v792_v28 = vadd.f32 %v4675_v17, %v767_v18  ;;  %v770_v30 = vadd.f32 %v3869_v23, %v459_v34  ;;  %v1471_v23 = vld [vmem:[%s6023_s1 + $0x48] sm:$0xf] }
 0x101   :  { %v702_v31 = vpop.f32.mrf.mxu0  ;;  %v906_v32 = vmax.f32 %v4678_v29, %v850_v19  ;;  %v929_v33 = vsel %vm513_vm3, %v926_v59, %v928_v10  ;;  %4070 = vmatprep.subr.mxu0 %v6025_v38  ;;  %v853_v40 = vrot.slane %v4736_v26, 1  ;;  %v932_v41 = vrot.slane %v4736_v26, 2 }
 0x102   :  { %v4747_v36 = vmax.f32 %v907_v24, %v931_v21  ;;  %v859_v44 = vrot.slane %v4738_v27, 1  ;;  %4071 = vmatpush3.msra.mxu0 %v1731_v13  ;;  %v938_v45 = vrot.slane %v4738_v27, 2  ;;  %v4753_v46 = vmax.f32 %v792_v28, 0.0 }
 0x103   :  { %v795_v34 = vadd.f32 %v4675_v17, %v770_v30  ;;  %v769_v29 = vadd.f32 %v702_v31, %v4681_v35  ;;  %v3872_v47 = vpop.f32.mrf.mxu0  ;;  %4190 = vmatprep.subr.mxu0 %v6025_v38  ;;  %v4759_v48 = vsel %vm54_vm1, %v851_v3, %v853_v40  ;;  %v856_v49 = vsel %vm54_vm1, %v853_v40, %v855_v22 }
 0x104   :  { %v935_v51 = vsel %vm513_vm3, %v932_v41, %v934_v25  ;;  %v772_v55 = vadd.f32 %v3872_v47, %v4683_v37  ;;  %v909_v56 = vmax.f32 %v4736_v26, %v856_v49  ;;  %v857_v35 = vrot.slane %v4753_v46, 1 }
 0x105   :  { %v936_v59 = vrot.slane %v4753_v46, 2  ;;  %v4771_v60 = vmax.f32 %v795_v34, 0.0  ;;  %v712_v61 = vpop.f32.mrf.mxu0  ;;  %v794_v62 = vadd.f32 %v4675_v17, %v769_v29  ;;  %v4775_v0 = vmax.f32 %v906_v32, %v929_v33 }
 0x106   :  { %v797_v63 = vadd.f32 %v4675_v17, %v772_v55  ;;  %v771_v1 = vadd.f32 %v712_v61, %v4685_v39  ;;  %v4778_v4 = vmax.f32 %v909_v56, %v935_v51  ;;  %v4781_v37 = vsel %vm54_vm1, %v855_v22, %v857_v35  ;;  %v1470_v55 = vld [vmem:[%s6023_s1 + $0x40] sm:$0xff] }
 0x107   :  { %v860_v2 = vsel %vm54_vm1, %v857_v35, %v859_v44  ;;  %v939_v3 = vsel %vm513_vm3, %v936_v59, %v938_v45  ;;  %v3875_v6 = vpop.f32.mrf.mxu0  ;;  %v863_v10 = vrot.slane %v4771_v60, 1  ;;  %v942_v39 = vrot.slane %v4771_v60, 2  ;;  %3954 = vmatmul.mubr.msk.f32.gmra.mxu0 %vm1067_vm5, %v4775_v0 }
 0x108   :  { %v911_v8 = vmax.f32 %v4753_v46, %v860_v2  ;;  %v4792_v9 = vmax.f32 %v794_v62, 0.0  ;;  %v4796_v12 = vmax.f32 %v797_v63, 0.0  ;;  %v796_v15 = vadd.f32 %v4675_v17, %v771_v1  ;;  %3956 = vmatprep.mubr.msk.f32.mxu0 %vm4355_vm4, %v6025_v38 }
 0x109   :  { %v1028_v16 = vrot.slane %v4712_v7, 1  ;;  %v1029_v18 = vrot.slane %v4775_v0, 1  ;;  %v722_v19 = vpop.f32.mrf.mxu0  ;;  %v774_v13 = vadd.f32 %v3875_v6, %v4688_v42  ;;  %v1031_v35 = vrot.slane %v4747_v36, 1 }
 0x10a   :  { %v4803_v20 = vmax.f32 %v911_v8, %v939_v3  ;;  %v861_v21 = vrot.slane %v4792_v9, 1  ;;  %v940_v22 = vrot.slane %v4792_v9, 2  ;;  %v867_v24 = vrot.slane %v4796_v12, 1 }
 0x10b   :  { %v946_v28 = vrot.slane %v4796_v12, 2  ;;  %v4813_v30 = vmax.f32 %v796_v15, 0.0  ;;  %v1030_v31 = vsel %vm54_vm1, %v1028_v16, %v1029_v18  ;;  %v3878_v32 = vpop.f32.mrf.mxu0  ;;  %v799_v34 = vadd.f32 %v4675_v17, %v774_v13  ;;  %3957 = vmatmul.mubr.msk.f32.gmra.mxu0 %vm1067_vm5, %v4747_v36 }
 0x10c   :  { %v4817_v33 = vsel %vm54_vm1, %v859_v44, %v861_v21  ;;  %v864_v40 = vsel %vm54_vm1, %v861_v21, %v863_v10  ;;  %v943_v42 = vsel %vm513_vm3, %v940_v22, %v942_v39  ;;  %3890 = vmatmul.mubr.msk.f32.vlgmr.msra.gmra.mxu1 %vm1067_vm5, %v1030_v31  ;;  %v773_v44 = vadd.f32 %v722_v19, %v4690_v43 }
 0x10d   :  { %v913_v29 = vmax.f32 %v4792_v9, %v864_v40  ;;  %v865_v47 = vrot.slane %v4813_v30, 1  ;;  %v944_v49 = vrot.slane %v4813_v30, 2  ;;  %4008 = vmatpush3.msk.msra.mxu1 %vm135_vm0, %v1471_v23  ;;  %v732_v51 = vpop.f32.mrf.mxu0  ;;  %v4837_v56 = vmax.f32 %v799_v34, 0.0  ;;  %3892 = vmatprep.mubr.msk.f32.mxu1 %vm4355_vm4, %v6025_v38 }
 0x10e   :  { %3959 = vmatprep.mubr.msk.f32.mxu0 %vm4355_vm4, %v6025_v38  ;;  %v776_v61 = vadd.f32 %v3878_v32, %v4695_v52  ;;  %v908_v43 = vmax.f32 %v4693_v50, %v4759_v48  ;;  %4009 = vmatprep.subr.mxu1 %v6025_v38  ;;  %v798_v8 = vadd.f32 %v4675_v17, %v773_v44 }
 0x10f   :  { %v4847_v62 = vmax.f32 %v913_v29, %v943_v42  ;;  %v4850_v63 = vsel %vm54_vm1, %v863_v10, %v865_v47  ;;  %v868_v1 = vsel %vm54_vm1, %v865_v47, %v867_v24  ;;  %v947_v2 = vsel %vm513_vm3, %v944_v49, %v946_v28  ;;  %v3881_v3 = vpop.f32.mrf.mxu0  ;;  %4010 = vmatpush3.msra.mxu1 %v1470_v55 }
 0x110   :  { %v915_v52 = vmax.f32 %v4813_v30, %v868_v1  ;;  %v871_v48 = vrot.slane %v4837_v56, 1  ;;  %v950_v6 = vrot.slane %v4837_v56, 2  ;;  %v1032_v10 = vsel %vm54_vm1, %v1029_v18, %v1031_v35  ;;  %4129 = vmatprep.subr.mxu1 %v6025_v38 }
 0x111   :  { %v801_v15 = vadd.f32 %v4675_v17, %v776_v61  ;;  %v933_v16 = vsel %vm513_vm3, %v930_v5, %v932_v41  ;;  %v775_v19 = vadd.f32 %v732_v51, %v4697_v53  ;;  %v742_v21 = vpop.f32.mrf.mxu0  ;;  %v818_v13 = vmax.f32 %v798_v8, 0.0  ;;  %3893 = vmatmul.mubr.msk.f32.gmra.mxu1 %vm1067_vm5, %v1032_v10 }
 0x112   :  { %v4874_v23 = vmax.f32 %v915_v52, %v947_v2  ;;  %v4877_v31 = vmax.f32 %v908_v43, %v933_v16  ;;  %v778_v18 = vadd.f32 %v3881_v3, %v4699_v54  ;;  %3895 = vmatprep.mubr.msk.f32.mxu1 %vm4355_vm4, %v6025_v38  ;;  %v777_v53 = vadd.f32 %v742_v21, %v4702_v57 }
 0x113   :  { %v4880_v32 = vmax.f32 %v801_v15, 0.0  ;;  %v800_v50 = vadd.f32 %v4675_v17, %v775_v19  ;;  %v1035_v5 = vrot.slane %v4778_v4, 1  ;;  %v869_v26 = vrot.slane %v818_v13, 1  ;;  %v3884_v47 = vpop.f32.mrf.mxu0 }
 0x114   :  { %v948_v41 = vrot.slane %v818_v13, 2  ;;  %3960 = vmatmul.mubr.msk.f32.gmra.mxu0 %vm1067_vm5, %v4877_v31  ;;  %v1033_v40 = vrot.slane %v4877_v31, 1  ;;  %v803_v54 = vadd.f32 %v4675_v17, %v778_v18  ;;  %v802_v57 = vadd.f32 %v4675_v17, %v777_v53 }
 0x115   :  { %v875_v42 = vrot.slane %v4880_v32, 1  ;;  %v954_v34 = vrot.slane %v4880_v32, 2  ;;  %v820_v29 = vmax.f32 %v800_v50, 0.0  ;;  %3962 = vmatprep.mubr.msk.f32.mxu0 %vm4355_vm4, %v6025_v38  ;;  %v4899_v44 = vsel %vm54_vm1, %v867_v24, %v869_v26 }
 0x116   :  { %v872_v51 = vsel %vm54_vm1, %v869_v26, %v871_v48  ;;  %v4905_v55 = vsel %vm513_vm3, %v946_v28, %v948_v41  ;;  %v951_v61 = vsel %vm513_vm3, %v948_v41, %v950_v6  ;;  %v916_v43 = vmax.f32 %v4796_v12, %v4899_v44 }
 0x117   :  { %v917_v1 = vmax.f32 %v818_v13, %v872_v51  ;;  %v873_v2 = vrot.slane %v820_v29, 1  ;;  %v952_v3 = vrot.slane %v820_v29, 2  ;;  %v1034_v52 = vsel %vm54_vm1, %v1031_v35, %v1033_v40  ;;  %v752_v35 = vpop.f32.mrf.mxu0 }
 0x118   :  { %v4911_v8 = vmax.f32 %v803_v54, 0.0  ;;  %3963 = vmatmul.mubr.msk.f32.gmra.mxu0 %vm1067_vm5, %v4778_v4  ;;  %v822_v24 = vmax.f32 %v802_v57, 0.0  ;;  %v1036_v28 = vsel %vm54_vm1, %v1033_v40, %v1035_v5  ;;  %3896 = vmatmul.mubr.msk.f32.gmra.mxu1 %vm1067_vm5, %v1034_v52  ;;  %v780_v26 = vadd.f32 %v3884_v47, %v4704_v58 }
 0x119   :  { %v4918_v10 = vmax.f32 %v917_v1, %v951_v61  ;;  %v4921_v15 = vsel %vm54_vm1, %v871_v48, %v873_v2  ;;  %v876_v16 = vsel %vm54_vm1, %v873_v2, %v875_v42  ;;  %v4925_v19 = vsel %vm513_vm3, %v950_v6, %v952_v3  ;;  %3898 = vmatprep.mubr.msk.f32.mxu1 %vm4355_vm4, %v6025_v38 }
 0x11a   :  { %v918_v21 = vmax.f32 %v4837_v56, %v4921_v15  ;;  %v919_v13 = vmax.f32 %v820_v29, %v876_v16  ;;  %v955_v18 = vsel %vm513_vm3, %v952_v3, %v954_v34  ;;  %v879_v50 = vrot.slane %v4911_v8, 1  ;;  %3965 = vmatprep.mubr.msk.f32.mxu0 %vm4355_vm4, %v6025_v38 }
 0x11b   :  { %v958_v48 = vrot.slane %v4911_v8, 2  ;;  %v877_v6 = vrot.slane %v822_v24, 1  ;;  %v956_v53 = vrot.slane %v822_v24, 2  ;;  %v910_v40 = vmax.f32 %v4714_v11, %v4781_v37 }
 0x11c   :  { %v4938_v41 = vmax.f32 %v919_v13, %v955_v18  ;;  %v937_v54 = vsel %vm513_vm3, %v934_v25, %v936_v59  ;;  %v779_v29 = vadd.f32 %v752_v35, %v4720_v14  ;;  %3899 = vmatmul.mubr.msk.f32.gmra.mxu1 %vm1067_vm5, %v1036_v28  ;;  %v805_v46 = vadd.f32 %v4675_v17, %v780_v26 }
 0x11d   :  { %v878_v57 = vsel %vm54_vm1, %v875_v42, %v877_v6  ;;  %v880_v51 = vsel %vm54_vm1, %v877_v6, %v879_v50  ;;  %v957_v61 = vsel %vm513_vm3, %v954_v34, %v956_v53  ;;  %v959_v58 = vsel %vm513_vm3, %v956_v53, %v958_v48  ;;  %3901 = vmatprep.mubr.msk.f32.mxu1 %vm4355_vm4, %v6025_v38 }
 0x11e   :  { %v920_v37 = vmax.f32 %v4880_v32, %v878_v57  ;;  %v921_v47 = vmax.f32 %v822_v24, %v880_v51  ;;  %v4955_v11 = vmax.f32 %v910_v40, %v937_v54  ;;  %v804_v14 = vadd.f32 %v4675_v17, %v779_v29 }
 0x11f   :  { %v1039_v25 = vrot.slane %v4803_v20, 1  ;;  %v912_v59 = vmax.f32 %v4738_v27, %v4817_v33  ;;  %v941_v32 = vsel %vm513_vm3, %v938_v45, %v940_v22  ;;  %v825_v34 = vmax.f32 %v805_v46, 0.0 }
 0x120   :  { %v4968_v42 = vmax.f32 %v921_v47, %v959_v58  ;;  %3966 = vmatmul.mubr.msk.f32.gmra.mxu0 %vm1067_vm5, %v4955_v11  ;;  %v1037_v1 = vrot.slane %v4955_v11, 1  ;;  %v1043_v17 = vrot.slane %v4847_v62, 1  ;;  %v824_v2 = vmax.f32 %v804_v14, 0.0 }
 0x121   :  { %3968 = vmatprep.mubr.msk.f32.mxu0 %vm4355_vm4, %v6025_v38  ;;  %v4976_v33 = vmax.f32 %v912_v59, %v941_v32  ;;  %v914_v27 = vmax.f32 %v4771_v60, %v4850_v63  ;;  %v945_v45 = vsel %vm513_vm3, %v942_v39, %v944_v49  ;;  %v883_v9 = vrot.slane %v825_v34, 1 }
 0x122   :  { %v962_v22 = vrot.slane %v825_v34, 2  ;;  %v1038_v3 = vsel %vm54_vm1, %v1035_v5, %v1037_v1  ;;  %v1040_v52 = vsel %vm54_vm1, %v1037_v1, %v1039_v25  ;;  %v881_v24 = vrot.slane %v824_v2, 1 }
 0x123   :  { %v960_v28 = vrot.slane %v824_v2, 2  ;;  %3902 = vmatmul.mubr.msk.f32.gmra.mxu1 %vm1067_vm5, %v1038_v3  ;;  %v1041_v63 = vrot.slane %v4976_v33, 1  ;;  %v4991_v30 = vmax.f32 %v914_v27, %v945_v45  ;;  %v924_v60 = vmax.f32 %v825_v34, %v883_v9 }
 0x124   :  { %3969 = vmatmul.mubr.msk.f32.gmra.mxu0 %vm1067_vm5, %v4803_v20  ;;  %3904 = vmatprep.mubr.msk.f32.mxu1 %vm4355_vm4, %v6025_v38  ;;  %v1047_v39 = vrot.slane %v4874_v23, 1  ;;  %v5002_v49 = vmax.f32 %v916_v43, %v4905_v55  ;;  %v1051_v5 = vrot.slane %v4918_v10, 1  ;;  %v882_v16 = vsel %vm54_vm1, %v879_v50, %v881_v24 }
 0x125   :  { %v884_v35 = vsel %vm54_vm1, %v881_v24, %v883_v9  ;;  %v961_v13 = vsel %vm513_vm3, %v958_v48, %v960_v28  ;;  %v963_v18 = vsel %vm513_vm3, %v960_v28, %v962_v22  ;;  %3971 = vmatprep.mubr.msk.f32.mxu0 %vm4355_vm4, %v6025_v38  ;;  %v5011_v6 = vmax.f32 %v924_v60, %v962_v22 }
 0x126   :  { %v922_v53 = vmax.f32 %v4911_v8, %v882_v16  ;;  %v923_v12 = vmax.f32 %v824_v2, %v884_v35  ;;  %v1042_v44 = vsel %vm54_vm1, %v1039_v25, %v1041_v63  ;;  %v1044_v55 = vsel %vm54_vm1, %v1041_v63, %v1043_v17 }
 0x127   :  { %3905 = vmatmul.mubr.msk.f32.gmra.mxu1 %vm1067_vm5, %v1040_v52  ;;  %v1045_v43 = vrot.slane %v4991_v30, 1  ;;  %v1049_v50 = vrot.slane %v5002_v49, 1  ;;  %v5023_v48 = vmax.f32 %v918_v21, %v4925_v19  ;;  %v1055_v8 = vrot.slane %v4938_v41, 1 }
 0x128   :  { %v5025_v26 = vmax.f32 %v923_v12, %v963_v18  ;;  %3972 = vmatmul.mubr.msk.f32.gmra.mxu0 %vm1067_vm5, %v4976_v33  ;;  %3907 = vmatprep.mubr.msk.f32.mxu1 %vm4355_vm4, %v6025_v38  ;;  %v5032_v40 = vmax.f32 %v920_v37, %v957_v61  ;;  %v1059_v54 = vrot.slane %v4968_v42, 1  ;;  %v5049_v51 = vmax.f32 %v922_v53, %v961_v13 }
 0x129   :  { %3974 = vmatprep.mubr.msk.f32.mxu0 %vm4355_vm4, %v6025_v38  ;;  %v1046_v56 = vsel %vm54_vm1, %v1043_v17, %v1045_v43  ;;  %v5039_v15 = vsel %vm54_vm1, %v1045_v43, %v1047_v39  ;;  %v5042_v19 = vsel %vm54_vm1, %v1047_v39, %v1049_v50  ;;  %v5045_v21 = vsel %vm54_vm1, %v1049_v50, %v1051_v5 }
 0x12a   :  { %v1053_v29 = vrot.slane %v5023_v48, 1  ;;  %v1057_v57 = vrot.slane %v5032_v40, 1  ;;  %v1063_v61 = vrot.slane %v5025_v26, 1  ;;  %v1734_v58 = vrot.slane %v4712_v7, 3 }
 0x12b   :  { %3908 = vmatmul.mubr.msk.f32.gmra.mxu1 %vm1067_vm5, %v1042_v44  ;;  %v1735_v37 = vrot.slane %v4775_v0, 3  ;;  %v1065_v47 = vrot.slane %v5011_v6, 1  ;;  %v1737_v46 = vrot.slane %v4747_v36, 3  ;;  %v1061_v32 = vrot.slane %v5049_v51, 1 }
 0x12c   :  { %3975 = vmatmul.mubr.msk.f32.gmra.mxu0 %vm1067_vm5, %v4847_v62  ;;  %3910 = vmatprep.mubr.msk.f32.mxu1 %vm4355_vm4, %v6025_v38  ;;  %v5062_v14 = vsel %vm54_vm1, %v1051_v5, %v1053_v29  ;;  %v5065_v25 = vsel %vm54_vm1, %v1053_v29, %v1055_v8  ;;  %v5068_v59 = vsel %vm54_vm1, %v1055_v8, %v1057_v57  ;;  %v1472_v9 = vrot.slane %v4712_v7, 2 }
 0x12d   :  { %3977 = vmatprep.mubr.msk.f32.mxu0 %vm4355_vm4, %v6025_v38  ;;  %v5074_v34 = vsel %vm54_vm1, %v1057_v57, %v1059_v54  ;;  %v5077_v1 = vsel %vm1733_vm6, %v1734_v58, %v1735_v37  ;;  %v5080_v17 = vsel %vm54_vm1, %v1063_v61, %v1065_v47  ;;  %v5083_v2 = vsel %vm1733_vm6, %v1735_v37, %v1737_v46 }
 0x12e   :  { %v5086_v27 = vsel %vm54_vm1, %v1059_v54, %v1061_v32  ;;  %v5089_v45 = vsel %vm54_vm1, %v1061_v32, %v1063_v61  ;;  %v1473_v22 = vrot.slane %v4775_v0, 2  ;;  %v1739_v3 = vrot.slane %v4877_v31, 3 }
 0x12f   :  { %3911 = vmatmul.mubr.msk.f32.gmra.mxu1 %vm1067_vm5, %v1044_v55  ;;  %v1475_v52 = vrot.slane %v4747_v36, 2  ;;  %v1741_v24 = vrot.slane %v4778_v4, 3  ;;  %v1477_v28 = vrot.slane %v4877_v31, 2  ;;  %v1743_v60 = vrot.slane %v4955_v11, 3 }
 0x130   :  { %3978 = vmatmul.mubr.msk.f32.gmra.mxu0 %vm1067_vm5, %v4991_v30  ;;  %3913 = vmatprep.mubr.msk.f32.mxu1 %vm4355_vm4, %v6025_v38  ;;  %v5103_v63 = vsel %vm513_vm3, %v1472_v9, %v1473_v22  ;;  %v1479_v39 = vrot.slane %v4778_v4, 2  ;;  %v1745_v5 = vrot.slane %v4803_v20, 3  ;;  %v5111_v16 = vsel %vm1733_vm6, %v1737_v46, %v1739_v3 }
 0x131   :  { %3980 = vmatprep.mubr.msk.f32.mxu0 %vm4355_vm4, %v6025_v38  ;;  %v5114_v35 = vsel %vm513_vm3, %v1473_v22, %v1475_v52  ;;  %v5117_v13 = vsel %vm1733_vm6, %v1739_v3, %v1741_v24  ;;  %v5120_v18 = vsel %vm513_vm3, %v1475_v52, %v1477_v28  ;;  %v5123_v53 = vsel %vm1733_vm6, %v1741_v24, %v1743_v60 }
 0x132   :  { %v5126_v12 = vsel %vm513_vm3, %v1477_v28, %v1479_v39  ;;  %v5129_v44 = vsel %vm1733_vm6, %v1743_v60, %v1745_v5  ;;  %v1481_v55 = vrot.slane %v4955_v11, 2  ;;  %v1747_v43 = vrot.slane %v4976_v33, 3 }
 0x133   :  { %3914 = vmatmul.mubr.msk.f32.gmra.mxu1 %vm1067_vm5, %v1046_v56  ;;  %v1483_v50 = vrot.slane %v4803_v20, 2  ;;  %v1749_v8 = vrot.slane %v4847_v62, 3  ;;  %v1485_v54 = vrot.slane %v4976_v33, 2  ;;  %v1751_v57 = vrot.slane %v4991_v30, 3 }
 0x134   :  { %3981 = vmatmul.mubr.msk.f32.gmra.mxu0 %vm1067_vm5, %v4874_v23  ;;  %3916 = vmatprep.mubr.msk.f32.mxu1 %vm4355_vm4, %v6025_v38  ;;  %v5142_v29 = vsel %vm513_vm3, %v1479_v39, %v1481_v55  ;;  %v1487_v56 = vrot.slane %v4847_v62, 2  ;;  %v1753_v61 = vrot.slane %v4874_v23, 3  ;;  %v5150_v58 = vsel %vm1733_vm6, %v1745_v5, %v1747_v43 }
 0x135   :  { %3983 = vmatprep.mubr.msk.f32.mxu0 %vm4355_vm4, %v6025_v38  ;;  %v5153_v37 = vsel %vm513_vm3, %v1481_v55, %v1483_v50  ;;  %v5156_v47 = vsel %vm1733_vm6, %v1747_v43, %v1749_v8  ;;  %v5159_v46 = vsel %vm513_vm3, %v1483_v50, %v1485_v54  ;;  %v5162_v32 = vsel %vm1733_vm6, %v1749_v8, %v1751_v57 }
 0x136   :  { %v5165_v9 = vsel %vm513_vm3, %v1485_v54, %v1487_v56  ;;  %v5168_v22 = vsel %vm1733_vm6, %v1751_v57, %v1753_v61  ;;  %v1489_v3 = vrot.slane %v4991_v30, 2  ;;  %v1755_v52 = vrot.slane %v5002_v49, 3 }
 0x137   :  { %3917 = vmatmul.mubr.msk.f32.gmra.mxu1 %vm1067_vm5, %v5039_v15  ;;  %v1491_v24 = vrot.slane %v4874_v23, 2  ;;  %v1757_v28 = vrot.slane %v4918_v10, 3  ;;  %v1493_v60 = vrot.slane %v5002_v49, 2  ;;  %v1759_v5 = vrot.slane %v5023_v48, 3 }
 0x138   :  { %3984 = vmatmul.mubr.msk.f32.gmra.mxu0 %vm1067_vm5, %v5002_v49  ;;  %3919 = vmatprep.mubr.msk.f32.mxu1 %vm4355_vm4, %v6025_v38  ;;  %v5182_v39 = vsel %vm513_vm3, %v1487_v56, %v1489_v3  ;;  %v1495_v15 = vrot.slane %v4918_v10, 2  ;;  %v1761_v55 = vrot.slane %v4938_v41, 3  ;;  %v5190_v43 = vsel %vm1733_vm6, %v1753_v61, %v1755_v52 }
 0x139   :  { %3986 = vmatprep.mubr.msk.f32.mxu0 %vm4355_vm4, %v6025_v38  ;;  %6027 = vst [vmem:[#allocation10_spill] sm:$0xff] %v5190_v43  ;;  %v5193_v50 = vsel %vm513_vm3, %v1489_v3, %v1491_v24  ;;  %v5196_v8 = vsel %vm1733_vm6, %v1755_v52, %v1757_v28  ;;  %v5199_v54 = vsel %vm513_vm3, %v1491_v24, %v1493_v60  ;;  %v1497_v61 = vrot.slane %v5023_v48, 2 }
 0x13a   :  { %6028 = vst [vmem:[#allocation11_spill] sm:$0xff] %v5193_v50  ;;  %6029 = vst [vmem:[#allocation12_spill] sm:$0xff] %v5196_v8  ;;  %v5202_v57 = vsel %vm1733_vm6, %v1757_v28, %v1759_v5  ;;  %v5205_v56 = vsel %vm513_vm3, %v1493_v60, %v1495_v15  ;;  %v5208_v38 = vsel %vm1733_vm6, %v1759_v5, %v1761_v55  ;;  %v1763_v3 = vrot.slane %v5032_v40, 3 }
 0x13b   :  { %6030 = vst [vmem:[#allocation13_spill] sm:$0xff] %v5199_v54  ;;  %6031 = vst [vmem:[#allocation14_spill] sm:$0xff] %v5202_v57  ;;  %3920 = vmatmul.mubr.msk.f32.gmra.mxu1 %vm1067_vm5, %v5042_v19  ;;  %v1499_v52 = vrot.slane %v4938_v41, 2  ;;  %v1765_v24 = vrot.slane %v4968_v42, 3  ;;  %v1501_v28 = vrot.slane %v5032_v40, 2  ;;  %v6034_v60 = vmov 0.0  }
 0x13c   :  { %6032 = vst [vmem:[#allocation15_spill] sm:$0xff] %v5205_v56  ;;  %6033 = vst [vmem:[#allocation16_spill] sm:$0xff] %v5208_v38  ;;  %3987 = vmatmul.mubr.msk.f32.gmra.mxu0 %vm1067_vm5, %v4918_v10  ;;  %3922 = vmatprep.mubr.msk.f32.mxu1 %vm4355_vm4, %v6034_v60  ;;  %v5222_v5 = vsel %vm513_vm3, %v1495_v15, %v1497_v61  ;;  %v1767_v38 = vrot.slane %v5049_v51, 3  ;;  %v1503_v19 = vrot.slane %v4968_v42, 2  ;;  %v1769_v56 = vrot.slane %v5025_v26, 3 }
 0x13d   :  { %6035 = vst [vmem:[#allocation17_spill] sm:$0xff] %v5222_v5  ;;  %3989 = vmatprep.mubr.msk.f32.mxu0 %vm4355_vm4, %v6034_v60  ;;  %v5230_v57 = vsel %vm1733_vm6, %v1761_v55, %v1763_v3  ;;  %v5233_v54 = vsel %vm513_vm3, %v1497_v61, %v1499_v52  ;;  %v5236_v8 = vsel %vm1733_vm6, %v1763_v3, %v1765_v24  ;;  %v1505_v55 = vrot.slane %v5049_v51, 2 }
 0x13e   :  { %v5239_v15 = vsel %vm513_vm3, %v1499_v52, %v1501_v28  ;;  %v5242_v5 = vsel %vm1733_vm6, %v1765_v24, %v1767_v38  ;;  %v5245_v50 = vsel %vm513_vm3, %v1501_v28, %v1503_v19  ;;  %v5248_v43 = vsel %vm1733_vm6, %v1767_v38, %v1769_v56 }
 0x13f   :  { %6036 = vst [vmem:[#allocation18_spill] sm:$0xff] %v5242_v5  ;;  %6037 = vst [vmem:[#allocation19_spill] sm:$0xff] %v5245_v50  ;;  %3923 = vmatmul.mubr.msk.f32.gmra.mxu1 %vm1067_vm5, %v5045_v21  ;;  %v1771_v61 = vrot.slane %v5011_v6, 3  ;;  %v1507_v3 = vrot.slane %v5025_v26, 2  ;;  %v1509_v52 = vrot.slane %v5011_v6, 2  ;;  %v1995_v24 = vrot.slane %v4712_v7, 4 }
 0x140   :  { %6038 = vst [vmem:[#allocation20_spill] sm:$0xff] %v5248_v43  ;;  %3990 = vmatmul.mubr.msk.f32.gmra.mxu0 %vm1067_vm5, %v5023_v48  ;;  %3925 = vmatprep.mubr.msk.f32.mxu1 %vm4355_vm4, %v6034_v60  ;;  %v5262_v38 = vsel %vm513_vm3, %v1503_v19, %v1505_v55  ;;  %v1996_v28 = vrot.slane %v4775_v0, 4  ;;  %v1998_v21 = vrot.slane %v4747_v36, 4  ;;  %v2000_v43 = vrot.slane %v4877_v31, 4 }
 0x141   :  { %3992 = vmatprep.mubr.msk.f32.mxu0 %vm4355_vm4, %v6034_v60  ;;  %v5270_v7 = vsel %vm1733_vm6, %v1769_v56, %v1771_v61  ;;  %v5273_v50 = vsel %vm513_vm3, %v1505_v55, %v1507_v3  ;;  %v5276_v5 = vsel %vm513_vm3, %v1507_v3, %v1509_v52  ;;  %v2002_v19 = vrot.slane %v4778_v4, 4 }
 0x142   :  { %v5280_v0 = vsel %vm135_vm0, %v1995_v24, %v1996_v28  ;;  %v5283_v36 = vsel %vm135_vm0, %v1996_v28, %v1998_v21  ;;  %v5286_v31 = vsel %vm135_vm0, %v1998_v21, %v2000_v43  ;;  %v2004_v56 = vrot.slane %v4955_v11, 4 }
 0x143   :  { %3926 = vmatmul.mubr.msk.f32.gmra.mxu1 %vm1067_vm5, %v5062_v14  ;;  %v5292_v55 = vsel %vm135_vm0, %v2000_v43, %v2002_v19  ;;  %v2006_v61 = vrot.slane %v4803_v20, 4  ;;  %v2008_v4 = vrot.slane %v4976_v33, 4  ;;  %v2010_v3 = vrot.slane %v4847_v62, 4 }
 0x144   :  { %3993 = vmatmul.mubr.msk.f32.gmra.mxu0 %vm1067_vm5, %v4938_v41  ;;  %3928 = vmatprep.mubr.msk.f32.mxu1 %vm4355_vm4, %v6034_v60  ;;  %v5302_v11 = vsel %vm135_vm0, %v2002_v19, %v2004_v56  ;;  %v2012_v14 = vrot.slane %v4991_v30, 4  ;;  %v2014_v43 = vrot.slane %v4874_v23, 4  ;;  %v2016_v52 = vrot.slane %v5002_v49, 4 }
 0x145   :  { %3995 = vmatprep.mubr.msk.f32.mxu0 %vm4355_vm4, %v6034_v60  ;;  %v5310_v20 = vsel %vm135_vm0, %v2004_v56, %v2006_v61  ;;  %v5313_v62 = vsel %vm135_vm0, %v2006_v61, %v2008_v4  ;;  %v5316_v33 = vsel %vm135_vm0, %v2008_v4, %v2010_v3  ;;  %v2018_v24 = vrot.slane %v4918_v10, 4 }
 0x146   :  { %v5320_v30 = vsel %vm135_vm0, %v2010_v3, %v2012_v14  ;;  %v5323_v23 = vsel %vm135_vm0, %v2012_v14, %v2014_v43  ;;  %v5326_v49 = vsel %vm135_vm0, %v2014_v43, %v2016_v52  ;;  %v2020_v28 = vrot.slane %v5023_v48, 4 }
 0x147   :  { %3929 = vmatmul.mubr.msk.f32.gmra.mxu1 %vm1067_vm5, %v5065_v25  ;;  %v5332_v21 = vsel %vm135_vm0, %v2016_v52, %v2018_v24  ;;  %v2022_v19 = vrot.slane %v4938_v41, 4  ;;  %v2024_v10 = vrot.slane %v5032_v40, 4  ;;  %v2026_v56 = vrot.slane %v4968_v42, 4 }
 0x148   :  { %3996 = vmatmul.mubr.msk.f32.gmra.mxu0 %vm1067_vm5, %v5032_v40  ;;  %3931 = vmatprep.mubr.msk.f32.mxu1 %vm4355_vm4, %v6034_v60  ;;  %v5342_v48 = vsel %vm135_vm0, %v2018_v24, %v2020_v28  ;;  %v2028_v25 = vrot.slane %v5049_v51, 4  ;;  %v2030_v61 = vrot.slane %v5025_v26, 4  ;;  %v2032_v4 = vrot.slane %v5011_v6, 4 }
 0x149   :  { %3998 = vmatprep.mubr.msk.f32.mxu0 %vm4355_vm4, %v6034_v60  ;;  %v5350_v41 = vsel %vm135_vm0, %v2020_v28, %v2022_v19  ;;  %v5353_v40 = vsel %vm135_vm0, %v2022_v19, %v2024_v10  ;;  %v5356_v3 = vsel %vm135_vm0, %v2024_v10, %v2026_v56 }
 0x14a   :  { %v5359_v14 = vsel %vm135_vm0, %v2026_v56, %v2028_v25  ;;  %v5362_v43 = vsel %vm135_vm0, %v2028_v25, %v2030_v61  ;;  %v5365_v6 = vsel %vm135_vm0, %v2030_v61, %v2032_v4 }
 0x14b   :  { %3932 = vmatmul.mubr.msk.f32.gmra.mxu1 %vm1067_vm5, %v5068_v59  ;;  %v6040_v59 = vld [vmem:[#allocation11_spill] sm:$0xff] }
 0x14c   :  { %3999 = vmatmul.mubr.msk.f32.gmra.mxu0 %vm1067_vm5, %v4968_v42  ;;  %3934 = vmatprep.mubr.msk.f32.mxu1 %vm4355_vm4, %v6034_v60  ;;  %v1994_v42 = vld [vmem:[%s6023_s1 + $0x68] sm:$0xf] }
 0x14d   :  { %4001 = vmatprep.mubr.msk.f32.mxu0 %vm4355_vm4, %v6034_v60 }
 0x14f   :  { %3935 = vmatmul.mubr.msk.f32.gmra.mxu1 %vm1067_vm5, %v5074_v34  ;;  %v6041_v34 = vld [vmem:[#allocation12_spill] sm:$0xff] }
 0x150   :  { %4002 = vmatmul.mubr.msk.f32.gmra.mxu0 %vm1067_vm5, %v5049_v51  ;;  %3937 = vmatprep.mubr.msk.f32.mxu1 %vm4355_vm4, %v6034_v60  ;;  %v6039_v51 = vld [vmem:[#allocation10_spill] sm:$0xff] }
 0x151   :  { %4004 = vmatprep.mubr.msk.f32.mxu0 %vm4355_vm4, %v6034_v60 }
 0x153   :  { %3938 = vmatmul.mubr.msk.f32.gmra.mxu1 %vm1067_vm5, %v5086_v27  ;;  %v6045_v27 = vld [vmem:[#allocation16_spill] sm:$0xff] }
 0x154   :  { %4005 = vmatmul.mubr.msk.f32.gmra.mxu0 %vm1067_vm5, %v5025_v26  ;;  %3940 = vmatprep.mubr.msk.f32.mxu1 %vm4355_vm4, %v6034_v60  ;;  %v1993_v26 = vld [vmem:[%s6023_s1 + $0x60] sm:$0xff] }
 0x155   :  { %4072 = vmatprep.mubr.msk.f32.mxu0 %vm4355_vm4, %v6034_v60 }
 0x157   :  { %3941 = vmatmul.mubr.msk.f32.gmra.mxu1 %vm1067_vm5, %v5089_v45  ;;  %v6046_v45 = vld [vmem:[#allocation17_spill] sm:$0xff] }
 0x158   :  { %4073 = vmatmul.mubr.msk.f32.vlgmr.msra.gmra.mxu0 %vm1067_vm5, %v5077_v1  ;;  %3943 = vmatprep.mubr.msk.f32.mxu1 %vm4355_vm4, %v6034_v60  ;;  %v6042_v1 = vld [vmem:[#allocation13_spill] sm:$0xff] }
 0x159   :  { %4075 = vmatprep.mubr.msk.f32.mxu0 %vm4355_vm4, %v6034_v60 }
 0x15b   :  { %3944 = vmatmul.mubr.msk.f32.gmra.mxu1 %vm1067_vm5, %v5080_v17  ;;  %v6043_v17 = vld [vmem:[#allocation14_spill] sm:$0xff] }
 0x15c   :  { %4076 = vmatmul.mubr.msk.f32.gmra.mxu0 %vm1067_vm5, %v5083_v2  ;;  %4011 = vmatprep.mubr.msk.f32.mxu1 %vm4355_vm4, %v6034_v60  ;;  %v6044_v2 = vld [vmem:[#allocation15_spill] sm:$0xff] }
 0x15d   :  { %4078 = vmatprep.mubr.msk.f32.mxu0 %vm4355_vm4, %v6034_v60 }
 0x15f   :  { %4012 = vmatmul.mubr.msk.f32.vlgmr.msra.gmra.mxu1 %vm1067_vm5, %v5103_v63  ;;  %v6047_v63 = vld [vmem:[#allocation18_spill] sm:$0xff] }
 0x160   :  { %4130 = vmatpush3.msk.msra.mxu1 %vm135_vm0, %v1994_v42  ;;  %4079 = vmatmul.mubr.msk.f32.gmra.mxu0 %vm1067_vm5, %v5111_v16  ;;  %v6048_v16 = vld [vmem:[#allocation19_spill] sm:$0xff] }
 0x161   :  { %4014 = vmatprep.mubr.msk.f32.mxu1 %vm4355_vm4, %v6034_v60  ;;  %4081 = vmatprep.mubr.msk.f32.mxu0 %vm4355_vm4, %v6034_v60 }
 0x162   :  { %4131 = vmatprep.subr.mxu1 %v6034_v60 }
 0x163   :  { %4015 = vmatmul.mubr.msk.f32.gmra.mxu1 %vm1067_vm5, %v5114_v35  ;;  %v6049_v35 = vld [vmem:[#allocation20_spill] sm:$0xff] }
 0x164   :  { %4082 = vmatmul.mubr.msk.f32.gmra.mxu0 %vm1067_vm5, %v5117_v13  ;;  %4017 = vmatprep.mubr.msk.f32.mxu1 %vm4355_vm4, %v6034_v60 }
 0x165   :  { %4084 = vmatprep.mubr.msk.f32.mxu0 %vm4355_vm4, %v6034_v60  ;;  %4132 = vmatpush3.msra.mxu1 %v1993_v26 }
 0x166   :  { %4232 = vmatprep.subr.mxu1 %v6034_v60 }
 0x167   :  { %4018 = vmatmul.mubr.msk.f32.gmra.mxu1 %vm1067_vm5, %v5120_v18 }
 0x168   :  { %4085 = vmatmul.mubr.msk.f32.gmra.mxu0 %vm1067_vm5, %v5123_v53  ;;  %4020 = vmatprep.mubr.msk.f32.mxu1 %vm4355_vm4, %v6034_v60 }
 0x169   :  { %4087 = vmatprep.mubr.msk.f32.mxu0 %vm4355_vm4, %v6034_v60 }
 0x16b   :  { %4021 = vmatmul.mubr.msk.f32.gmra.mxu1 %vm1067_vm5, %v5126_v12 }
 0x16c   :  { %4088 = vmatmul.mubr.msk.f32.gmra.mxu0 %vm1067_vm5, %v5129_v44  ;;  %4023 = vmatprep.mubr.msk.f32.mxu1 %vm4355_vm4, %v6034_v60 }
 0x16d   :  { %4090 = vmatprep.mubr.msk.f32.mxu0 %vm4355_vm4, %v6034_v60 }
 0x16f   :  { %4024 = vmatmul.mubr.msk.f32.gmra.mxu1 %vm1067_vm5, %v5142_v29 }
 0x170   :  { %4091 = vmatmul.mubr.msk.f32.gmra.mxu0 %vm1067_vm5, %v5150_v58  ;;  %4026 = vmatprep.mubr.msk.f32.mxu1 %vm4355_vm4, %v6034_v60 }
 0x171   :  { %4093 = vmatprep.mubr.msk.f32.mxu0 %vm4355_vm4, %v6034_v60 }
 0x173   :  { %4027 = vmatmul.mubr.msk.f32.gmra.mxu1 %vm1067_vm5, %v5153_v37 }
 0x174   :  { %4094 = vmatmul.mubr.msk.f32.gmra.mxu0 %vm1067_vm5, %v5156_v47  ;;  %4029 = vmatprep.mubr.msk.f32.mxu1 %vm4355_vm4, %v6034_v60 }
 0x175   :  { %4096 = vmatprep.mubr.msk.f32.mxu0 %vm4355_vm4, %v6034_v60 }
 0x177   :  { %4030 = vmatmul.mubr.msk.f32.gmra.mxu1 %vm1067_vm5, %v5159_v46 }
 0x178   :  { %4097 = vmatmul.mubr.msk.f32.gmra.mxu0 %vm1067_vm5, %v5162_v32  ;;  %4032 = vmatprep.mubr.msk.f32.mxu1 %vm4355_vm4, %v6034_v60 }
 0x179   :  { %4099 = vmatprep.mubr.msk.f32.mxu0 %vm4355_vm4, %v6034_v60 }
 0x17b   :  { %4033 = vmatmul.mubr.msk.f32.gmra.mxu1 %vm1067_vm5, %v5165_v9 }
 0x17c   :  { %4100 = vmatmul.mubr.msk.f32.gmra.mxu0 %vm1067_vm5, %v5168_v22  ;;  %4035 = vmatprep.mubr.msk.f32.mxu1 %vm4355_vm4, %v6034_v60 }
 0x17d   :  { %4102 = vmatprep.mubr.msk.f32.mxu0 %vm4355_vm4, %v6034_v60 }
 0x17f   :  { %4036 = vmatmul.mubr.msk.f32.gmra.mxu1 %vm1067_vm5, %v5182_v39 }
 0x180   :  { %4103 = vmatmul.mubr.msk.f32.gmra.mxu0 %vm1067_vm5, %v6039_v51  ;;  %4038 = vmatprep.mubr.msk.f32.mxu1 %vm4355_vm4, %v6034_v60 }
 0x181   :  { %4105 = vmatprep.mubr.msk.f32.mxu0 %vm4355_vm4, %v6034_v60 }
 0x183   :  { %4039 = vmatmul.mubr.msk.f32.gmra.mxu1 %vm1067_vm5, %v6040_v59 }
 0x184   :  { %4106 = vmatmul.mubr.msk.f32.gmra.mxu0 %vm1067_vm5, %v6041_v34  ;;  %4041 = vmatprep.mubr.msk.f32.mxu1 %vm4355_vm4, %v6034_v60 }
 0x185   :  { %4108 = vmatprep.mubr.msk.f32.mxu0 %vm4355_vm4, %v6034_v60 }
 0x187   :  { %4042 = vmatmul.mubr.msk.f32.gmra.mxu1 %vm1067_vm5, %v6042_v1 }
 0x188   :  { %4109 = vmatmul.mubr.msk.f32.gmra.mxu0 %vm1067_vm5, %v6043_v17  ;;  %4044 = vmatprep.mubr.msk.f32.mxu1 %vm4355_vm4, %v6034_v60 }
 0x189   :  { %4111 = vmatprep.mubr.msk.f32.mxu0 %vm4355_vm4, %v6034_v60 }
 0x18b   :  { %4045 = vmatmul.mubr.msk.f32.gmra.mxu1 %vm1067_vm5, %v6044_v2 }
 0x18c   :  { %4112 = vmatmul.mubr.msk.f32.gmra.mxu0 %vm1067_vm5, %v6045_v27  ;;  %4047 = vmatprep.mubr.msk.f32.mxu1 %vm4355_vm4, %v6034_v60 }
 0x18d   :  { %4114 = vmatprep.mubr.msk.f32.mxu0 %vm4355_vm4, %v6034_v60 }
 0x18f   :  { %4048 = vmatmul.mubr.msk.f32.gmra.mxu1 %vm1067_vm5, %v6046_v45  ;;  %v2431_v45 = vld [vmem:[%s6023_s1 + $0xa0] sm:$0xf] }
 0x190   :  { %4115 = vmatmul.mubr.msk.f32.gmra.mxu0 %vm1067_vm5, %v5230_v57  ;;  %4050 = vmatprep.mubr.msk.f32.mxu1 %vm4355_vm4, %v6034_v60 }
 0x191   :  { %4117 = vmatprep.mubr.msk.f32.mxu0 %vm4355_vm4, %v6034_v60  ;;  %4191 = vmatpush3.msk.msra.mxu0 %vm135_vm0, %v2431_v45  ;;  %v2429_v45 = vld [vmem:[%s6023_s1 + $0x90] sm:$0xff] }
 0x192   :  { %4192 = vmatprep.subr.mxu0 %v6034_v60 }
 0x193   :  { %4051 = vmatmul.mubr.msk.f32.gmra.mxu1 %vm1067_vm5, %v5233_v54 }
 0x194   :  { %4118 = vmatmul.mubr.msk.f32.gmra.mxu0 %vm1067_vm5, %v5236_v8  ;;  %4053 = vmatprep.mubr.msk.f32.mxu1 %vm4355_vm4, %v6034_v60 }
 0x195   :  { %4120 = vmatprep.mubr.msk.f32.mxu0 %vm4355_vm4, %v6034_v60 }
 0x197   :  { %4054 = vmatmul.mubr.msk.f32.gmra.mxu1 %vm1067_vm5, %v5239_v15 }
 0x198   :  { %4121 = vmatmul.mubr.msk.f32.gmra.mxu0 %vm1067_vm5, %v6047_v63  ;;  %4056 = vmatprep.mubr.msk.f32.mxu1 %vm4355_vm4, %v6034_v60 }
 0x199   :  { %4123 = vmatprep.mubr.msk.f32.mxu0 %vm4355_vm4, %v6034_v60 }
 0x19b   :  { %4057 = vmatmul.mubr.msk.f32.gmra.mxu1 %vm1067_vm5, %v6048_v16 }
 0x19c   :  { %4124 = vmatmul.mubr.msk.f32.gmra.mxu0 %vm1067_vm5, %v6049_v35  ;;  %4059 = vmatprep.mubr.msk.f32.mxu1 %vm4355_vm4, %v6034_v60 }
 0x19d   :  { %4126 = vmatprep.mubr.msk.f32.mxu0 %vm4355_vm4, %v6034_v60 }
 0x19f   :  { %4060 = vmatmul.mubr.msk.f32.gmra.mxu1 %vm1067_vm5, %v5262_v38 }
 0x1a0   :  { %4127 = vmatmul.mubr.msk.f32.gmra.mxu0 %vm1067_vm5, %v5270_v7  ;;  %4062 = vmatprep.mubr.msk.f32.mxu1 %vm4355_vm4, %v6034_v60 }
 0x1a1   :  { %4196 = vmatprep.mubr.msk.f32.mxu0 %vm4355_vm4, %v6034_v60 }
 0x1a3   :  { %4063 = vmatmul.mubr.msk.f32.gmra.mxu1 %vm1067_vm5, %v5273_v50 }
 0x1a4   :  { %4065 = vmatprep.mubr.msk.f32.mxu1 %vm4355_vm4, %v6034_v60 }
 0x1a7   :  { %4066 = vmatmul.mubr.msk.f32.gmra.mxu1 %vm1067_vm5, %v5276_v5 }
 0x1a8   :  { %4133 = vmatprep.mubr.msk.f32.mxu1 %vm4355_vm4, %v6034_v60 }
 0x1ab   :  { %4134 = vmatmul.mubr.msk.f32.vlgmr.msra.gmra.mxu1 %vm1067_vm5, %v5280_v0 }
 0x1ac   :  { %4136 = vmatprep.mubr.msk.f32.mxu1 %vm4355_vm4, %v6034_v60 }
 0x1af   :  { %4137 = vmatmul.mubr.msk.f32.gmra.mxu1 %vm1067_vm5, %v5283_v36 }
 0x1b0   :  { %4139 = vmatprep.mubr.msk.f32.mxu1 %vm4355_vm4, %v6034_v60 }
 0x1b3   :  { %4140 = vmatmul.mubr.msk.f32.gmra.mxu1 %vm1067_vm5, %v5286_v31 }
 0x1b4   :  { %4142 = vmatprep.mubr.msk.f32.mxu1 %vm4355_vm4, %v6034_v60 }
 0x1b7   :  { %4143 = vmatmul.mubr.msk.f32.gmra.mxu1 %vm1067_vm5, %v5292_v55 }
 0x1b8   :  { %4145 = vmatprep.mubr.msk.f32.mxu1 %vm4355_vm4, %v6034_v60 }
 0x1bb   :  { %4146 = vmatmul.mubr.msk.f32.gmra.mxu1 %vm1067_vm5, %v5302_v11 }
 0x1bc   :  { %4148 = vmatprep.mubr.msk.f32.mxu1 %vm4355_vm4, %v6034_v60 }
 0x1bf   :  { %4149 = vmatmul.mubr.msk.f32.gmra.mxu1 %vm1067_vm5, %v5310_v20  ;;  %v1376_v13 = vpop.f32.mrf.mxu0 }
 0x1c0   :  { %4151 = vmatprep.mubr.msk.f32.mxu1 %vm4355_vm4, %v6034_v60 }
 0x1c1   :  { %v3952_v18 = vpop.f32.mrf.mxu0 }
 0x1c3   :  { %4152 = vmatmul.mubr.msk.f32.gmra.mxu1 %vm1067_vm5, %v5313_v62 }
 0x1c4   :  { %4154 = vmatprep.mubr.msk.f32.mxu1 %vm4355_vm4, %v6034_v60 }
 0x1c7   :  { %4155 = vmatmul.mubr.msk.f32.gmra.mxu1 %vm1067_vm5, %v5316_v33  ;;  %v1381_v53 = vpop.f32.mrf.mxu0 }
 0x1c8   :  { %4157 = vmatprep.mubr.msk.f32.mxu1 %vm4355_vm4, %v6034_v60 }
 0x1c9   :  { %v3955_v12 = vpop.f32.mrf.mxu0 }
 0x1cb   :  { %4158 = vmatmul.mubr.msk.f32.gmra.mxu1 %vm1067_vm5, %v5320_v30  ;;  %v1386_v58 = vpop.f32.mrf.mxu0 }
 0x1cc   :  { %4160 = vmatprep.mubr.msk.f32.mxu1 %vm4355_vm4, %v6034_v60  ;;  %v1175_v44 = vpop.f32.mrf.mxu1 }
 0x1cd   :  { %v5596_v29 = vadd.f32 %v1376_v13, %v1175_v44  ;;  %v3958_v47 = vpop.f32.mrf.mxu0 }
 0x1ce   :  { %v3891_v37 = vpop.f32.mrf.mxu1 }
 0x1cf   :  { %4161 = vmatmul.mubr.msk.f32.gmra.mxu1 %vm1067_vm5, %v5323_v23 }
 0x1d0   :  { %4163 = vmatprep.mubr.msk.f32.mxu1 %vm4355_vm4, %v6034_v60 }
 0x1d1   :  { %v1180_v46 = vpop.f32.mrf.mxu1 }
 0x1d2   :  { %v5604_v32 = vadd.f32 %v1381_v53, %v1180_v46 }
 0x1d3   :  { %4164 = vmatmul.mubr.msk.f32.gmra.mxu1 %vm1067_vm5, %v5326_v49  ;;  %v3894_v22 = vpop.f32.mrf.mxu1 }
 0x1d4   :  { %4166 = vmatprep.mubr.msk.f32.mxu1 %vm4355_vm4, %v6034_v60  ;;  %v1391_v9 = vpop.f32.mrf.mxu0 }
 0x1d6   :  { %v3961_v39 = vpop.f32.mrf.mxu0 }
 0x1d7   :  { %4167 = vmatmul.mubr.msk.f32.gmra.mxu1 %vm1067_vm5, %v5332_v21 }
 0x1d8   :  { %4169 = vmatprep.mubr.msk.f32.mxu1 %vm4355_vm4, %v6034_v60  ;;  %v1396_v50 = vpop.f32.mrf.mxu0  ;;  %v1185_v8 = vpop.f32.mrf.mxu1 }
 0x1d9   :  { %v5612_v54 = vadd.f32 %v1386_v58, %v1185_v8 }
 0x1da   :  { %v3964_v57 = vpop.f32.mrf.mxu0  ;;  %v3897_v5 = vpop.f32.mrf.mxu1 }
 0x1db   :  { %4170 = vmatmul.mubr.msk.f32.gmra.mxu1 %vm1067_vm5, %v5342_v48 }
 0x1dc   :  { %4172 = vmatprep.mubr.msk.f32.mxu1 %vm4355_vm4, %v6034_v60  ;;  %v1190_v15 = vpop.f32.mrf.mxu1 }
 0x1dd   :  { %v5618_v38 = vadd.f32 %v1391_v9, %v1190_v15 }
 0x1de   :  { %v3900_v7 = vpop.f32.mrf.mxu1 }
 0x1df   :  { %4173 = vmatmul.mubr.msk.f32.gmra.mxu1 %vm1067_vm5, %v5350_v41 }
 0x1e0   :  { %v1401_v0 = vpop.f32.mrf.mxu0  ;;  %4175 = vmatprep.mubr.msk.f32.mxu1 %vm4355_vm4, %v6034_v60 }
 0x1e2   :  { %v3967_v36 = vpop.f32.mrf.mxu0 }
 0x1e3   :  { %v1195_v31 = vpop.f32.mrf.mxu1  ;;  %4176 = vmatmul.mubr.msk.f32.gmra.mxu1 %vm1067_vm5, %v5353_v40 }
 0x1e4   :  { %v5626_v55 = vadd.f32 %v1396_v50, %v1195_v31  ;;  %v1406_v11 = vpop.f32.mrf.mxu0  ;;  %4178 = vmatprep.mubr.msk.f32.mxu1 %vm4355_vm4, %v6034_v60 }
 0x1e5   :  { %v3903_v52 = vpop.f32.mrf.mxu1 }
 0x1e6   :  { %v3970_v20 = vpop.f32.mrf.mxu0 }
 0x1e7   :  { %v1200_v62 = vpop.f32.mrf.mxu1  ;;  %4179 = vmatmul.mubr.msk.f32.gmra.mxu1 %vm1067_vm5, %v5356_v3 }
 0x1e8   :  { %v5632_v33 = vadd.f32 %v1401_v0, %v1200_v62  ;;  %v1411_v24 = vpop.f32.mrf.mxu0  ;;  %4181 = vmatprep.mubr.msk.f32.mxu1 %vm4355_vm4, %v6034_v60 }
 0x1e9   :  { %v3906_v30 = vpop.f32.mrf.mxu1 }
 0x1ea   :  { %v3973_v23 = vpop.f32.mrf.mxu0 }
 0x1eb   :  { %v1205_v49 = vpop.f32.mrf.mxu1  ;;  %4182 = vmatmul.mubr.msk.f32.gmra.mxu1 %vm1067_vm5, %v5359_v14  ;;  %v2660_v23 = vld [vmem:[%s6023_s1 + $0xb8] sm:$0xf] }
 0x1ec   :  { %v5638_v28 = vadd.f32 %v1406_v11, %v1205_v49  ;;  %v1416_v21 = vpop.f32.mrf.mxu0  ;;  %4184 = vmatprep.mubr.msk.f32.mxu1 %vm4355_vm4, %v6034_v60  ;;  %4233 = vmatpush3.msk.msra.mxu1 %vm135_vm0, %v2660_v23 }
 0x1ed   :  { %v3909_v19 = vpop.f32.mrf.mxu1  ;;  %4234 = vmatprep.subr.mxu1 %v6034_v60 }
 0x1ee   :  { %v3976_v10 = vpop.f32.mrf.mxu0 }
 0x1ef   :  { %v1210_v56 = vpop.f32.mrf.mxu1  ;;  %4185 = vmatmul.mubr.msk.f32.gmra.mxu1 %vm1067_vm5, %v5362_v43 }
 0x1f0   :  { %v5644_v48 = vadd.f32 %v1411_v24, %v1210_v56  ;;  %v1421_v25 = vpop.f32.mrf.mxu0  ;;  %4187 = vmatprep.mubr.msk.f32.mxu1 %vm4355_vm4, %v6034_v60 }
 0x1f1   :  { %v3912_v61 = vpop.f32.mrf.mxu1 }
 0x1f2   :  { %v3979_v4 = vpop.f32.mrf.mxu0 }
 0x1f3   :  { %v1215_v41 = vpop.f32.mrf.mxu1  ;;  %4188 = vmatmul.mubr.msk.f32.gmra.mxu1 %vm1067_vm5, %v5365_v6 }
 0x1f4   :  { %v5650_v40 = vadd.f32 %v1416_v21, %v1215_v41  ;;  %v1426_v3 = vpop.f32.mrf.mxu0  ;;  %4238 = vmatprep.mubr.msk.f32.mxu1 %vm4355_vm4, %v6034_v60  ;;  %v2430_v41 = vld [vmem:[%s6023_s1 + $0x98] sm:$0xff] }
 0x1f5   :  { %v3915_v14 = vpop.f32.mrf.mxu1  ;;  %4193 = vmatpush3.msra.mxu0 %v2430_v41 }
 0x1f6   :  { %v3982_v43 = vpop.f32.mrf.mxu0  ;;  %4194 = vmatprep.subr.mxu0 %v6034_v60 }
 0x1f7   :  { %v1220_v42 = vpop.f32.mrf.mxu1  ;;  %4195 = vmatpush3.msra.mxu0 %v2429_v45 }
 0x1f8   :  { %v5654_v26 = vadd.f32 %v1421_v25, %v1220_v42  ;;  %v1431_v51 = vpop.f32.mrf.mxu0  ;;  %4211 = vmatprep.subr.mxu0 %v6034_v60 }
 0x1f9   :  { %v3918_v59 = vpop.f32.mrf.mxu1 }
 0x1fa   :  { %v3985_v34 = vpop.f32.mrf.mxu0 }
 0x1fb   :  { %v1225_v1 = vpop.f32.mrf.mxu1 }
 0x1fc   :  { %v5656_v17 = vadd.f32 %v1426_v3, %v1225_v1  ;;  %v1436_v2 = vpop.f32.mrf.mxu0 }
 0x1fd   :  { %v3921_v27 = vpop.f32.mrf.mxu1 }
 0x1fe   :  { %v3988_v6 = vpop.f32.mrf.mxu0 }
 0x1ff   :  { %v1230_v63 = vpop.f32.mrf.mxu1 }
 0x200   :  { %v5662_v16 = vadd.f32 %v1431_v51, %v1230_v63  ;;  %v1441_v35 = vpop.f32.mrf.mxu0 }
 0x201   :  { %v3924_v13 = vpop.f32.mrf.mxu1 }
 0x202   :  { %v3991_v18 = vpop.f32.mrf.mxu0 }
 0x203   :  { %v1235_v53 = vpop.f32.mrf.mxu1 }
 0x204   :  { %v5665_v12 = vadd.f32 %v1436_v2, %v1235_v53  ;;  %v1446_v44 = vpop.f32.mrf.mxu0 }
 0x205   :  { %v3927_v58 = vpop.f32.mrf.mxu1 }
 0x206   :  { %v3994_v37 = vpop.f32.mrf.mxu0 }
 0x207   :  { %v1240_v47 = vpop.f32.mrf.mxu1 }
 0x208   :  { %v5667_v46 = vadd.f32 %v1441_v35, %v1240_v47  ;;  %v1451_v9 = vpop.f32.mrf.mxu0 }
 0x209   :  { %v3930_v22 = vpop.f32.mrf.mxu1 }
 0x20a   :  { %v3997_v39 = vpop.f32.mrf.mxu0 }
 0x20b   :  { %v1245_v50 = vpop.f32.mrf.mxu1  ;;  %v2658_v39 = vld [vmem:[%s6023_s1 + $0xa8] sm:$0xff] }
 0x20c   :  { %v5669_v8 = vadd.f32 %v1446_v44, %v1245_v50  ;;  %v1456_v57 = vpop.f32.mrf.mxu0 }
 0x20d   :  { %v3933_v5 = vpop.f32.mrf.mxu1 }
 0x20e   :  { %v4000_v15 = vpop.f32.mrf.mxu0 }
 0x20f   :  { %v1250_v7 = vpop.f32.mrf.mxu1 }
 0x210   :  { %v5671_v0 = vadd.f32 %v1451_v9, %v1250_v7  ;;  %v1461_v36 = vpop.f32.mrf.mxu0 }
 0x211   :  { %v3936_v31 = vpop.f32.mrf.mxu1 }
 0x212   :  { %v4003_v11 = vpop.f32.mrf.mxu0 }
 0x213   :  { %v1255_v52 = vpop.f32.mrf.mxu1 }
 0x214   :  { %v5673_v20 = vadd.f32 %v1456_v57, %v1255_v52  ;;  %v1466_v62 = vpop.f32.mrf.mxu0 }
 0x215   :  { %v3939_v24 = vpop.f32.mrf.mxu1 }
 0x216   :  { %v4006_v30 = vpop.f32.mrf.mxu0 }
 0x217   :  { %v1260_v49 = vpop.f32.mrf.mxu1 }
 0x218   :  { %v5679_v21 = vadd.f32 %v1461_v36, %v1260_v49  ;;  %v1880_v19 = vpop.f32.mrf.mxu0 }
 0x219   :  { %v3942_v10 = vpop.f32.mrf.mxu1 }
 0x21a   :  { %v4074_v56 = vpop.f32.mrf.mxu0 }
 0x21b   :  { %v1265_v25 = vpop.f32.mrf.mxu1 }
 0x21c   :  { %v5682_v61 = vadd.f32 %v1466_v62, %v1265_v25  ;;  %v1885_v4 = vpop.f32.mrf.mxu0 }
 0x21d   :  { %v3945_v3 = vpop.f32.mrf.mxu1 }
 0x21e   :  { %v4077_v14 = vpop.f32.mrf.mxu0 }
 0x21f   :  { %v1618_v43 = vpop.f32.mrf.mxu1 }
 0x220   :  { %v1712_v42 = vadd.f32 %v1618_v43, %v5596_v29  ;;  %v1890_v51 = vpop.f32.mrf.mxu0  ;;  %v2659_v29 = vld [vmem:[%s6023_s1 + $0xb0] sm:$0xff] }
 0x221   :  { %v4013_v59 = vpop.f32.mrf.mxu1  ;;  %4235 = vmatpush3.msra.mxu1 %v2659_v29 }
 0x222   :  { %v4080_v34 = vpop.f32.mrf.mxu0  ;;  %v5689_v1 = vadd.f32 %v1880_v19, %v1712_v42  ;;  %4236 = vmatprep.subr.mxu1 %v6034_v60 }
 0x223   :  { %v1623_v2 = vpop.f32.mrf.mxu1  ;;  %4237 = vmatpush3.msra.mxu1 %v2658_v39 }
 0x224   :  { %v1713_v27 = vadd.f32 %v1623_v2, %v5604_v32  ;;  %v1895_v6 = vpop.f32.mrf.mxu0  ;;  %4286 = vmatprep.subr.mxu1 %v6034_v60 }
 0x225   :  { %v4016_v63 = vpop.f32.mrf.mxu1 }
 0x226   :  { %v4083_v35 = vpop.f32.mrf.mxu0  ;;  %v5695_v13 = vadd.f32 %v1885_v4, %v1713_v27 }
 0x227   :  { %v1628_v18 = vpop.f32.mrf.mxu1 }
 0x228   :  { %v1714_v32 = vadd.f32 %v1628_v18, %v5612_v54  ;;  %v1900_v53 = vpop.f32.mrf.mxu0 }
 0x229   :  { %v4019_v44 = vpop.f32.mrf.mxu1 }
 0x22a   :  { %v4086_v58 = vpop.f32.mrf.mxu0  ;;  %v5703_v37 = vadd.f32 %v1890_v51, %v1714_v32 }
 0x22b   :  { %v1633_v47 = vpop.f32.mrf.mxu1 }
 0x22c   :  { %v1715_v9 = vadd.f32 %v1633_v47, %v5618_v38  ;;  %v1905_v22 = vpop.f32.mrf.mxu0 }
 0x22d   :  { %v4022_v50 = vpop.f32.mrf.mxu1 }
 0x22e   :  { %v4089_v57 = vpop.f32.mrf.mxu0  ;;  %v5709_v5 = vadd.f32 %v1895_v6, %v1715_v9 }
 0x22f   :  { %v1638_v54 = vpop.f32.mrf.mxu1 }
 0x230   :  { %v1716_v15 = vadd.f32 %v1638_v54, %v5626_v55  ;;  %v1910_v7 = vpop.f32.mrf.mxu0 }
 0x231   :  { %v4025_v36 = vpop.f32.mrf.mxu1 }
 0x232   :  { %v4092_v31 = vpop.f32.mrf.mxu0  ;;  %v5713_v11 = vadd.f32 %v1900_v53, %v1716_v15 }
 0x233   :  { %v1643_v38 = vpop.f32.mrf.mxu1 }
 0x234   :  { %v1717_v52 = vadd.f32 %v1643_v38, %v5632_v33  ;;  %v1915_v62 = vpop.f32.mrf.mxu0 }
 0x235   :  { %v4028_v24 = vpop.f32.mrf.mxu1 }
 0x236   :  { %v4095_v30 = vpop.f32.mrf.mxu0  ;;  %v5716_v23 = vadd.f32 %v1905_v22, %v1717_v52 }
 0x237   :  { %v1648_v49 = vpop.f32.mrf.mxu1 }
 0x238   :  { %v1718_v19 = vadd.f32 %v1648_v49, %v5638_v28  ;;  %v1920_v10 = vpop.f32.mrf.mxu0 }
 0x239   :  { %v4031_v56 = vpop.f32.mrf.mxu1 }
 0x23a   :  { %v4098_v25 = vpop.f32.mrf.mxu0  ;;  %v5719_v55 = vadd.f32 %v1910_v7, %v1718_v19 }
 0x23b   :  { %v1653_v4 = vpop.f32.mrf.mxu1 }
 0x23c   :  { %v1719_v41 = vadd.f32 %v1653_v4, %v5644_v48  ;;  %v1925_v3 = vpop.f32.mrf.mxu0 }
 0x23d   :  { %v4034_v14 = vpop.f32.mrf.mxu1 }
 0x23e   :  { %v4101_v43 = vpop.f32.mrf.mxu0  ;;  %v5722_v33 = vadd.f32 %v1915_v62, %v1719_v41 }
 0x23f   :  { %v1658_v42 = vpop.f32.mrf.mxu1 }
 0x240   :  { %v1720_v51 = vadd.f32 %v1658_v42, %v5650_v40  ;;  %v1930_v59 = vpop.f32.mrf.mxu0 }
 0x241   :  { %v4037_v34 = vpop.f32.mrf.mxu1 }
 0x242   :  { %v4104_v2 = vpop.f32.mrf.mxu0  ;;  %v5725_v28 = vadd.f32 %v1920_v10, %v1720_v51 }
 0x243   :  { %v1663_v27 = vpop.f32.mrf.mxu1 }
 0x244   :  { %v1721_v6 = vadd.f32 %v1663_v27, %v5654_v26  ;;  %v1935_v45 = vpop.f32.mrf.mxu0 }
 0x245   :  { %v4040_v63 = vpop.f32.mrf.mxu1 }
 0x246   :  { %v4107_v35 = vpop.f32.mrf.mxu0  ;;  %v5728_v48 = vadd.f32 %v1925_v3, %v1721_v6 }
 0x247   :  { %v1668_v29 = vpop.f32.mrf.mxu1 }
 0x248   :  { %v1722_v18 = vadd.f32 %v1668_v29, %v5656_v17  ;;  %v1940_v32 = vpop.f32.mrf.mxu0 }
 0x249   :  { %v4043_v53 = vpop.f32.mrf.mxu1 }
 0x24a   :  { %v4110_v44 = vpop.f32.mrf.mxu0  ;;  %v5731_v40 = vadd.f32 %v1930_v59, %v1722_v18 }
 0x24b   :  { %v1673_v58 = vpop.f32.mrf.mxu1 }
 0x24c   :  { %v1723_v47 = vadd.f32 %v1673_v58, %v5662_v16  ;;  %v1945_v9 = vpop.f32.mrf.mxu0 }
 0x24d   :  { %v4046_v22 = vpop.f32.mrf.mxu1 }
 0x24e   :  { %v4113_v39 = vpop.f32.mrf.mxu0  ;;  %v5734_v26 = vadd.f32 %v1935_v45, %v1723_v47 }
 0x24f   :  { %v1678_v50 = vpop.f32.mrf.mxu1 }
 0x250   :  { %v1724_v57 = vadd.f32 %v1678_v50, %v5665_v12  ;;  %v1950_v54 = vpop.f32.mrf.mxu0 }
 0x251   :  { %v4049_v15 = vpop.f32.mrf.mxu1 }
 0x252   :  { %v4116_v7 = vpop.f32.mrf.mxu0  ;;  %v5737_v17 = vadd.f32 %v1940_v32, %v1724_v57 }
 0x253   :  { %v1683_v36 = vpop.f32.mrf.mxu1 }
 0x254   :  { %v1725_v31 = vadd.f32 %v1683_v36, %v5667_v46  ;;  %v1955_v38 = vpop.f32.mrf.mxu0 }
 0x255   :  { %v4052_v52 = vpop.f32.mrf.mxu1 }
 0x256   :  { %v4119_v62 = vpop.f32.mrf.mxu0  ;;  %v5740_v16 = vadd.f32 %v1945_v9, %v1725_v31 }
 0x257   :  { %v1688_v24 = vpop.f32.mrf.mxu1 }
 0x258   :  { %v1726_v30 = vadd.f32 %v1688_v24, %v5669_v8  ;;  %v1960_v49 = vpop.f32.mrf.mxu0 }
 0x259   :  { %v4055_v19 = vpop.f32.mrf.mxu1 }
 0x25a   :  { %v4122_v10 = vpop.f32.mrf.mxu0  ;;  %v5743_v12 = vadd.f32 %v1950_v54, %v1726_v30 }
 0x25b   :  { %v1693_v56 = vpop.f32.mrf.mxu1 }
 0x25c   :  { %v1727_v25 = vadd.f32 %v1693_v56, %v5671_v0  ;;  %v1965_v4 = vpop.f32.mrf.mxu0 }
 0x25d   :  { %v4058_v41 = vpop.f32.mrf.mxu1 }
 0x25e   :  { %v4125_v3 = vpop.f32.mrf.mxu0  ;;  %v5746_v46 = vadd.f32 %v1955_v38, %v1727_v25 }
 0x25f   :  { %v1698_v14 = vpop.f32.mrf.mxu1 }
 0x260   :  { %v1728_v43 = vadd.f32 %v1698_v14, %v5673_v20  ;;  %v1970_v42 = vpop.f32.mrf.mxu0  ;;  %v5760_v20 = vld [vmem:[%s6023_s1 + $0x70] ss:$0 sm:$0xff] }
 0x261   :  { %v4061_v51 = vpop.f32.mrf.mxu1 }
 0x262   :  { %v4128_v59 = vpop.f32.mrf.mxu0  ;;  %v5749_v8 = vadd.f32 %v1960_v49, %v1728_v43 }
 0x263   :  { %v1703_v34 = vpop.f32.mrf.mxu1 }
 0x264   :  { %v1729_v2 = vadd.f32 %v1703_v34, %v5679_v21 }
 0x265   :  { %v4064_v27 = vpop.f32.mrf.mxu1 }
 0x266   :  { %v5752_v6 = vadd.f32 %v1965_v4, %v1729_v2 }
 0x267   :  { %v1708_v0 = vpop.f32.mrf.mxu1 }
 0x268   :  { %v1730_v45 = vadd.f32 %v1708_v0, %v5682_v61 }
 0x269   :  { %v4067_v63 = vpop.f32.mrf.mxu1 }
 0x26a   :  { %v5755_v35 = vadd.f32 %v1970_v42, %v1730_v45 }
 0x26b   :  { %v2141_v29 = vpop.f32.mrf.mxu1 }
 0x26c   :  { %v2235_v18 = vadd.f32 %v2141_v29, %v5689_v1 }
 0x26d   :  { %v4135_v32 = vpop.f32.mrf.mxu1 }
 0x26e   :  { %v2259_v21 = vadd.f32 %v5760_v20, %v2235_v18 }
 0x26f   :  { %v2146_v53 = vpop.f32.mrf.mxu1 }
 0x270   :  { %v2278_v44 = vmax.f32 %v2259_v21, 0.0  ;;  %v2236_v58 = vadd.f32 %v2146_v53, %v5695_v13 }
 0x271   :  { %v4138_v61 = vpop.f32.mrf.mxu1 }
 0x272   :  { %2298 = vst.msk [vmem:[#allocation2] sm:$0xff] %vm2297_vm7, %v2278_v44  ;;  %v2260_v47 = vadd.f32 %v5760_v20, %v2236_v58 }
 0x273   :  { %v2151_v9 = vpop.f32.mrf.mxu1 }
 0x274   :  { %v2279_v22 = vmax.f32 %v2260_v47, 0.0  ;;  %v2237_v39 = vadd.f32 %v2151_v9, %v5703_v37 }
 0x275   :  { %v4141_v50 = vpop.f32.mrf.mxu1 }
 0x276   :  { %2299 = vst.msk [vmem:[#allocation2 + $0x8] sm:$0xff] %vm2297_vm7, %v2279_v22  ;;  %v2261_v1 = vadd.f32 %v5760_v20, %v2237_v39 }
 0x277   :  { %v2156_v57 = vpop.f32.mrf.mxu1 }
 0x278   :  { %v2280_v54 = vmax.f32 %v2261_v1, 0.0  ;;  %v2238_v15 = vadd.f32 %v2156_v57, %v5709_v5 }
 0x279   :  { %v4144_v7 = vpop.f32.mrf.mxu1 }
 0x27a   :  { %2300 = vst.msk [vmem:[#allocation2 + $0x10] sm:$0xff] %vm2297_vm7, %v2280_v54  ;;  %v2262_v13 = vadd.f32 %v5760_v20, %v2238_v15 }
 0x27b   :  { %v2161_v36 = vpop.f32.mrf.mxu1 }
 0x27c   :  { %v2281_v31 = vmax.f32 %v2262_v13, 0.0  ;;  %v2239_v38 = vadd.f32 %v2161_v36, %v5713_v11 }
 0x27d   :  { %v2317_v52 = vld [vmem:[#allocation2] ss:$2 sm:$0xff]  ;;  %v2337_v37 = vld [vmem:[#allocation2 + $0x1] ss:$2 sm:$0xff]  ;;  %v4147_v62 = vpop.f32.mrf.mxu1 }
 0x27e   :  { %2301 = vst.msk [vmem:[#allocation2 + $0x18] sm:$0xff] %vm2297_vm7, %v2281_v31  ;;  %v2263_v24 = vadd.f32 %v5760_v20, %v2239_v38  ;;  %v2356_v49 = vmax.f32 %v2317_v52, %v2337_v37 }
 0x27f   :  { %v2166_v30 = vpop.f32.mrf.mxu1 }
 0x280   :  { %v2282_v19 = vmax.f32 %v2263_v24, 0.0  ;;  %v2240_v5 = vadd.f32 %v2166_v30, %v5716_v23 }
 0x281   :  { %v2367_v10 = vld [vmem:[#allocation2 + $0x2] ss:$2 sm:$0xff]  ;;  %v4150_v56 = vpop.f32.mrf.mxu1 }
 0x282   :  { %v2386_v25 = vmax.f32 %v2356_v49, %v2367_v10  ;;  %2302 = vst.msk [vmem:[#allocation2 + $0x20] sm:$0xff] %vm2297_vm7, %v2282_v19  ;;  %v2264_v4 = vadd.f32 %v5760_v20, %v2240_v5 }
 0x283   :  { %v2171_v11 = vpop.f32.mrf.mxu1 }
 0x284   :  { %2396 = vst.msk [vmem:[#allocation3] sm:$0xff] %vm2297_vm7, %v2386_v25  ;;  %v2283_v41 = vmax.f32 %v2264_v4, 0.0  ;;  %v2241_v3 = vadd.f32 %v2171_v11, %v5719_v55 }
 0x285   :  { %v2319_v14 = vld [vmem:[#allocation2 + $0x10] ss:$2 sm:$0xff]  ;;  %v2339_v43 = vld [vmem:[#allocation2 + $0x11] ss:$2 sm:$0xff]  ;;  %v4153_v42 = vpop.f32.mrf.mxu1 }
 0x286   :  { %2303 = vst.msk [vmem:[#allocation2 + $0x28] sm:$0xff] %vm2297_vm7, %v2283_v41  ;;  %v2265_v23 = vadd.f32 %v5760_v20, %v2241_v3  ;;  %v2357_v59 = vmax.f32 %v2319_v14, %v2339_v43 }
 0x287   :  { %v2176_v51 = vpop.f32.mrf.mxu1 }
 0x288   :  { %v2284_v34 = vmax.f32 %v2265_v23, 0.0  ;;  %v2242_v2 = vadd.f32 %v2176_v51, %v5722_v33 }
 0x289   :  { %v2369_v27 = vld [vmem:[#allocation2 + $0x12] ss:$2 sm:$0xff]  ;;  %v4156_v0 = vpop.f32.mrf.mxu1 }
 0x28a   :  { %v2387_v45 = vmax.f32 %v2357_v59, %v2369_v27  ;;  %2304 = vst.msk [vmem:[#allocation2 + $0x30] sm:$0xff] %vm2297_vm7, %v2284_v34  ;;  %v2266_v63 = vadd.f32 %v5760_v20, %v2242_v2 }
 0x28b   :  { %v2181_v55 = vpop.f32.mrf.mxu1 }
 0x28c   :  { %2397 = vst.msk [vmem:[#allocation3 + $0x8] sm:$0xff] %vm2297_vm7, %v2387_v45  ;;  %v2285_v29 = vmax.f32 %v2266_v63, 0.0  ;;  %v2243_v18 = vadd.f32 %v2181_v55, %v5725_v28  ;;  %v2418_v28 = vld [vmem:[%s6023_s1 + $0x88] sm:$0xf] }
 0x28d   :  { %v2321_v32 = vld [vmem:[#allocation2 + $0x20] ss:$2 sm:$0xff]  ;;  %v2341_v21 = vld [vmem:[#allocation2 + $0x21] ss:$2 sm:$0xff]  ;;  %v4159_v53 = vpop.f32.mrf.mxu1 }
 0x28e   :  { %2305 = vst.msk [vmem:[#allocation2 + $0x38] sm:$0xff] %vm2297_vm7, %v2285_v29  ;;  %v2267_v33 = vadd.f32 %v5760_v20, %v2243_v18  ;;  %v2358_v58 = vmax.f32 %v2321_v32, %v2341_v21 }
 0x28f   :  { %v2186_v44 = vpop.f32.mrf.mxu1 }
 0x290   :  { %v2286_v61 = vmax.f32 %v2267_v33, 0.0  ;;  %v2244_v47 = vadd.f32 %v2186_v44, %v5728_v48  ;;  %v2417_v48 = vld [vmem:[%s6023_s1 + $0x80] sm:$0xff] }
 0x291   :  { %v2371_v9 = vld [vmem:[#allocation2 + $0x22] ss:$2 sm:$0xff]  ;;  %v4162_v22 = vpop.f32.mrf.mxu1 }
 0x292   :  { %v2388_v39 = vmax.f32 %v2358_v58, %v2371_v9  ;;  %2306 = vst.msk [vmem:[#allocation2 + $0x40] sm:$0xff] %vm2297_vm7, %v2286_v61  ;;  %v2268_v50 = vadd.f32 %v5760_v20, %v2244_v47 }
 0x293   :  { %v2191_v1 = vpop.f32.mrf.mxu1  ;;  %v2420_v57 = vld [vmem:[#allocation3 + $0x1] ss:$2 sm:$0xff] }
 0x294   :  { %2398 = vst.msk [vmem:[#allocation3 + $0x10] sm:$0xff] %vm2297_vm7, %v2388_v39  ;;  %v2287_v54 = vmax.f32 %v2268_v50, 0.0  ;;  %v2245_v15 = vadd.f32 %v2191_v1, %v5731_v40  ;;  %4197 = vmatmul.mubr.msk.f32.vlgmr.msra.gmra.mxu0 %vm2297_vm7, %v2420_v57  ;;  %v2416_v40 = vld [vmem:[%s6023_s1 + $0x78] sm:$0xff] }
 0x295   :  { %v2323_v7 = vld [vmem:[#allocation2 + $0x30] ss:$2 sm:$0xff]  ;;  %v2343_v13 = vld [vmem:[#allocation2 + $0x31] ss:$2 sm:$0xff]  ;;  %v4165_v36 = vpop.f32.mrf.mxu1  ;;  %4199 = vmatprep.mubr.msk.f32.mxu0 %vm4355_vm4, %v6034_v60  ;;  %4212 = vmatpush3.msk.msra.mxu0 %vm135_vm0, %v2418_v28 }
 0x296   :  { %2307 = vst.msk [vmem:[#allocation2 + $0x48] sm:$0xff] %vm2297_vm7, %v2287_v54  ;;  %v2269_v31 = vadd.f32 %v5760_v20, %v2245_v15  ;;  %4213 = vmatprep.subr.mxu0 %v6034_v60  ;;  %v2359_v52 = vmax.f32 %v2323_v7, %v2343_v13 }
 0x297   :  { %v2196_v38 = vpop.f32.mrf.mxu1  ;;  %4214 = vmatpush3.msra.mxu0 %v2417_v48 }
 0x298   :  { %v2288_v37 = vmax.f32 %v2269_v31, 0.0  ;;  %v2246_v62 = vadd.f32 %v2196_v38, %v5734_v26  ;;  %4215 = vmatprep.subr.mxu0 %v6034_v60 }
 0x299   :  { %v2373_v24 = vld [vmem:[#allocation2 + $0x32] ss:$2 sm:$0xff]  ;;  %v4168_v30 = vpop.f32.mrf.mxu1  ;;  %4216 = vmatpush3.msra.mxu0 %v2416_v40 }
 0x29a   :  { %v2389_v49 = vmax.f32 %v2359_v52, %v2373_v24  ;;  %2308 = vst.msk [vmem:[#allocation2 + $0x50] sm:$0xff] %vm2297_vm7, %v2288_v37  ;;  %v2270_v19 = vadd.f32 %v5760_v20, %v2246_v62  ;;  %4253 = vmatprep.subr.mxu0 %v6034_v60 }
 0x29b   :  { %v2201_v5 = vpop.f32.mrf.mxu1  ;;  %v2649_v10 = vld [vmem:[#allocation3 + $0x2] ss:$2 sm:$0xff] }
 0x29c   :  { %2399 = vst.msk [vmem:[#allocation3 + $0x18] sm:$0xff] %vm2297_vm7, %v2389_v49  ;;  %v2289_v56 = vmax.f32 %v2270_v19, 0.0  ;;  %v2247_v25 = vadd.f32 %v2201_v5, %v5737_v17  ;;  %4239 = vmatmul.mubr.msk.f32.vlgmr.msra.gmra.mxu1 %vm2297_vm7, %v2649_v10 }
 0x29d   :  { %v2325_v26 = vld [vmem:[#allocation2 + $0x40] ss:$2 sm:$0xff]  ;;  %v2345_v4 = vld [vmem:[#allocation2 + $0x41] ss:$2 sm:$0xff]  ;;  %v4171_v11 = vpop.f32.mrf.mxu1  ;;  %4241 = vmatprep.mubr.msk.f32.mxu1 %vm4355_vm4, %v6034_v60 }
 0x29e   :  { %2309 = vst.msk [vmem:[#allocation2 + $0x58] sm:$0xff] %vm2297_vm7, %v2289_v56  ;;  %v2271_v41 = vadd.f32 %v5760_v20, %v2247_v25  ;;  %v2360_v14 = vmax.f32 %v2325_v26, %v2345_v4 }
 0x29f   :  { %v2206_v3 = vpop.f32.mrf.mxu1 }
 0x2a0   :  { %v2290_v43 = vmax.f32 %v2271_v41, 0.0  ;;  %v2248_v42 = vadd.f32 %v2206_v3, %v5740_v16 }
 0x2a1   :  { %v2375_v23 = vld [vmem:[#allocation2 + $0x42] ss:$2 sm:$0xff]  ;;  %v4174_v51 = vpop.f32.mrf.mxu1 }
 0x2a2   :  { %v2390_v17 = vmax.f32 %v2360_v14, %v2375_v23  ;;  %2310 = vst.msk [vmem:[#allocation2 + $0x60] sm:$0xff] %vm2297_vm7, %v2290_v43  ;;  %v2272_v59 = vadd.f32 %v5760_v20, %v2248_v42  ;;  %v2407_v23 = vld [vmem:[#allocation3] ss:$2 sm:$0xff] }
 0x2a3   :  { %v2211_v34 = vpop.f32.mrf.mxu1  ;;  %v2422_v2 = vld [vmem:[#allocation3 + $0x11] ss:$2 sm:$0xff]  ;;  %v2409_v51 = vld [vmem:[#allocation3 + $0x10] ss:$2 sm:$0xff] }
 0x2a4   :  { %2400 = vst.msk [vmem:[#allocation3 + $0x20] sm:$0xff] %vm2297_vm7, %v2390_v17  ;;  %v2291_v27 = vmax.f32 %v2272_v59, 0.0  ;;  %v2249_v0 = vadd.f32 %v2211_v34, %v5743_v12  ;;  %4200 = vmatmul.mubr.msk.f32.gmra.mxu0 %vm2297_vm7, %v2422_v2  ;;  %v2851_v2 = vld [vmem:[%s6023_s1 + $0x100] sm:$0xff] }
 0x2a5   :  { %v2327_v45 = vld [vmem:[#allocation2 + $0x50] ss:$2 sm:$0xff]  ;;  %v2347_v63 = vld [vmem:[#allocation2 + $0x51] ss:$2 sm:$0xff]  ;;  %v4177_v55 = vpop.f32.mrf.mxu1  ;;  %4202 = vmatprep.mubr.msk.f32.mxu0 %vm4355_vm4, %v6034_v60 }
 0x2a6   :  { %2311 = vst.msk [vmem:[#allocation2 + $0x68] sm:$0xff] %vm2297_vm7, %v2291_v27  ;;  %v2273_v16 = vadd.f32 %v5760_v20, %v2249_v0  ;;  %v2361_v18 = vmax.f32 %v2327_v45, %v2347_v63  ;;  %v2850_v27 = vld [vmem:[%s6023_s1 + $0xf8] sm:$0xff]  ;;  %v3083_v0 = vld [vmem:[%s6023_s1 + $0x140] sm:$0xff]  ;;  %v2849_v63 = vld [vmem:[%s6023_s1 + $0xf0] sm:$0xff] }
 0x2a7   :  { %v2216_v29 = vpop.f32.mrf.mxu1  ;;  %v3082_v45 = vld [vmem:[%s6023_s1 + $0x138] sm:$0xff]  ;;  %4287 = vmatpush3.msra.mxu1 %v3083_v0  ;;  %v3081_v55 = vld [vmem:[%s6023_s1 + $0x130] sm:$0xff] }
 0x2a8   :  { %v2292_v32 = vmax.f32 %v2273_v16, 0.0  ;;  %v2250_v21 = vadd.f32 %v2216_v29, %v5746_v46  ;;  %4288 = vmatprep.subr.mxu1 %v6034_v60  ;;  %v2848_v16 = vld [vmem:[%s6023_s1 + $0xe8] sm:$0xff] }
 0x2a9   :  { %v2377_v53 = vld [vmem:[#allocation2 + $0x52] ss:$2 sm:$0xff]  ;;  %v4180_v33 = vpop.f32.mrf.mxu1  ;;  %4289 = vmatpush3.msra.mxu1 %v3082_v45  ;;  %v3080_v29 = vld [vmem:[%s6023_s1 + $0x128] sm:$0xff] }
 0x2aa   :  { %v2391_v12 = vmax.f32 %v2361_v18, %v2377_v53  ;;  %2312 = vst.msk [vmem:[#allocation2 + $0x70] sm:$0xff] %vm2297_vm7, %v2292_v32  ;;  %v2274_v44 = vadd.f32 %v5760_v20, %v2250_v21  ;;  %4290 = vmatprep.subr.mxu1 %v6034_v60 }
 0x2ab   :  { %v2221_v58 = vpop.f32.mrf.mxu1  ;;  %v2651_v61 = vld [vmem:[#allocation3 + $0x12] ss:$2 sm:$0xff]  ;;  %4291 = vmatpush3.msra.mxu1 %v3081_v55 }
 0x2ac   :  { %2401 = vst.msk [vmem:[#allocation3 + $0x28] sm:$0xff] %vm2297_vm7, %v2391_v12  ;;  %v2293_v47 = vmax.f32 %v2274_v44, 0.0  ;;  %v2251_v9 = vadd.f32 %v2221_v58, %v5749_v8  ;;  %4242 = vmatmul.mubr.msk.f32.gmra.mxu1 %vm2297_vm7, %v2651_v61  ;;  %4292 = vmatprep.subr.mxu1 %v6034_v60 }
 0x2ad   :  { %v2329_v22 = vld [vmem:[#allocation2 + $0x60] ss:$2 sm:$0xff]  ;;  %v2349_v39 = vld [vmem:[#allocation2 + $0x61] ss:$2 sm:$0xff]  ;;  %v4183_v50 = vpop.f32.mrf.mxu1  ;;  %4244 = vmatprep.mubr.msk.f32.mxu1 %vm4355_vm4, %v6034_v60  ;;  %4293 = vmatpush3.msra.mxu1 %v3080_v29 }
 0x2ae   :  { %2313 = vst.msk [vmem:[#allocation2 + $0x78] sm:$0xff] %vm2297_vm7, %v2293_v47  ;;  %v2275_v46 = vadd.f32 %v5760_v20, %v2251_v9  ;;  %v2362_v1 = vmax.f32 %v2329_v22, %v2349_v39  ;;  %4308 = vmatprep.subr.mxu1 %v6034_v60 }
 0x2af   :  { %v2226_v28 = vpop.f32.mrf.mxu1 }
 0x2b0   :  { %v2294_v57 = vmax.f32 %v2275_v46, 0.0  ;;  %v2252_v54 = vadd.f32 %v2226_v28, %v5752_v6 }
 0x2b1   :  { %v2379_v15 = vld [vmem:[#allocation2 + $0x62] ss:$2 sm:$0xff]  ;;  %v4186_v48 = vpop.f32.mrf.mxu1 }
 0x2b2   :  { %v2392_v8 = vmax.f32 %v2362_v1, %v2379_v15  ;;  %2314 = vst.msk [vmem:[#allocation2 + $0x80] sm:$0xff] %vm2297_vm7, %v2294_v57  ;;  %v2276_v7 = vadd.f32 %v5760_v20, %v2252_v54 }
 0x2b3   :  { %v2231_v13 = vpop.f32.mrf.mxu1  ;;  %v2424_v36 = vld [vmem:[#allocation3 + $0x21] ss:$2 sm:$0xff]  ;;  %v2411_v17 = vld [vmem:[#allocation3 + $0x20] ss:$2 sm:$0xff] }
 0x2b4   :  { %2402 = vst.msk [vmem:[#allocation3 + $0x30] sm:$0xff] %vm2297_vm7, %v2392_v8  ;;  %v2295_v31 = vmax.f32 %v2276_v7, 0.0  ;;  %v2253_v40 = vadd.f32 %v2231_v13, %v5755_v35  ;;  %4203 = vmatmul.mubr.msk.f32.gmra.mxu0 %vm2297_vm7, %v2424_v36  ;;  %v3557_v7 = vld [vmem:[%s6023_s1 + $0xc0] ss:$0 sm:$0xff] }
 0x2b5   :  { %v2331_v38 = vld [vmem:[#allocation2 + $0x70] ss:$2 sm:$0xff]  ;;  %v2351_v52 = vld [vmem:[#allocation2 + $0x71] ss:$2 sm:$0xff]  ;;  %v4189_v37 = vpop.f32.mrf.mxu1  ;;  %4205 = vmatprep.mubr.msk.f32.mxu0 %vm4355_vm4, %v6034_v60 }
 0x2b6   :  { %2315 = vst.msk [vmem:[#allocation2 + $0x88] sm:$0xff] %vm2297_vm7, %v2295_v31  ;;  %v2277_v6 = vadd.f32 %v5760_v20, %v2253_v40  ;;  %v2363_v62 = vmax.f32 %v2331_v38, %v2351_v52 }
 0x2b8   :  { %v2296_v24 = vmax.f32 %v2277_v6, 0.0 }
 0x2b9   :  { %v2381_v30 = vld [vmem:[#allocation2 + $0x72] ss:$2 sm:$0xff] }
 0x2ba   :  { %v2393_v49 = vmax.f32 %v2363_v62, %v2381_v30  ;;  %2316 = vst.msk [vmem:[#allocation2 + $0x90] sm:$0xff] %vm2297_vm7, %v2296_v24 }
 0x2bb   :  { %v2653_v19 = vld [vmem:[#allocation3 + $0x22] ss:$2 sm:$0xff] }
 0x2bc   :  { %2403 = vst.msk [vmem:[#allocation3 + $0x38] sm:$0xff] %vm2297_vm7, %v2393_v49  ;;  %4245 = vmatmul.mubr.msk.f32.gmra.mxu1 %vm2297_vm7, %v2653_v19 }
 0x2bd   :  { %4247 = vmatprep.mubr.msk.f32.mxu1 %vm4355_vm4, %v6034_v60  ;;  %v2333_v35 = vld [vmem:[#allocation2 + $0x80] ss:$2 sm:$0xff]  ;;  %v2353_v5 = vld [vmem:[#allocation2 + $0x81] ss:$2 sm:$0xff] }
 0x2be   :  { %v2364_v10 = vmax.f32 %v2333_v35, %v2353_v5 }
 0x2c1   :  { %v2335_v56 = vld [vmem:[#allocation2 + $0x90] ss:$2 sm:$0x7]  ;;  %v2355_v25 = vld [vmem:[#allocation2 + $0x91] ss:$2 sm:$0x7] }
 0x2c2   :  { %v2365_v20 = vmax.f32 %v2335_v56, %v2355_v25  ;;  %v2383_v26 = vld [vmem:[#allocation2 + $0x82] ss:$2 sm:$0xff]  ;;  %v2385_v4 = vld [vmem:[#allocation2 + $0x92] ss:$2 sm:$0x7] }
 0x2c3   :  { %v2394_v11 = vmax.f32 %v2364_v10, %v2383_v26  ;;  %v2426_v41 = vld [vmem:[#allocation3 + $0x31] ss:$2 sm:$0xff]  ;;  %v2413_v59 = vld [vmem:[#allocation3 + $0x30] ss:$2 sm:$0xff] }
 0x2c4   :  { %v2395_v3 = vmax.f32 %v2365_v20, %v2385_v4  ;;  %4206 = vmatmul.mubr.msk.f32.gmra.mxu0 %vm2297_vm7, %v2426_v41 }
 0x2c5   :  { %2404 = vst.msk [vmem:[#allocation3 + $0x40] sm:$0xff] %vm2297_vm7, %v2394_v11  ;;  %4208 = vmatprep.mubr.msk.f32.mxu0 %vm4355_vm4, %v6034_v60 }
 0x2c6   :  { %2406 = vst.msk [vmem:[#allocation3 + $0x48] sm:$0x7] %vm2405_vm8, %v2395_v3 }
 0x2cc   :  { %v2655_v14 = vld [vmem:[#allocation3 + $0x32] ss:$2 sm:$0xff] }
 0x2cd   :  { %4248 = vmatmul.mubr.msk.f32.gmra.mxu1 %vm2297_vm7, %v2655_v14  ;;  %v2428_v43 = vld [vmem:[#allocation3 + $0x41] ss:$2 sm:$0x1f]  ;;  %v2657_v42 = vld [vmem:[#allocation3 + $0x42] ss:$2 sm:$0x1f] }
 0x2ce   :  { %4209 = vmatmul.mubr.msk.f32.gmra.mxu0 %vm2297_vm7, %v2428_v43  ;;  %4250 = vmatprep.mubr.msk.f32.mxu1 %vm4355_vm4, %v6034_v60  ;;  %v2415_v34 = vld [vmem:[#allocation3 + $0x40] ss:$2 sm:$0x1f] }
 0x2cf   :  { %4217 = vmatprep.mubr.msk.f32.mxu0 %vm4355_vm4, %v6034_v60 }
 0x2d1   :  { %4251 = vmatmul.mubr.msk.f32.gmra.mxu1 %vm2297_vm7, %v2657_v42 }
 0x2d2   :  { %4218 = vmatmul.mubr.msk.f32.vlgmr.msra.gmra.mxu0 %vm2297_vm7, %v2407_v23  ;;  %4294 = vmatprep.mubr.msk.f32.mxu1 %vm4355_vm4, %v6034_v60 }
 0x2d3   :  { %4220 = vmatprep.mubr.msk.f32.mxu0 %vm4355_vm4, %v6034_v60  ;;  %4254 = vmatpush3.msra.mxu0 %v2851_v2 }
 0x2d4   :  { %4255 = vmatprep.subr.mxu0 %v6034_v60 }
 0x2d5   :  { %4256 = vmatpush3.msra.mxu0 %v2850_v27 }
 0x2d6   :  { %4221 = vmatmul.mubr.msk.f32.gmra.mxu0 %vm2297_vm7, %v2409_v51  ;;  %4257 = vmatprep.subr.mxu0 %v6034_v60 }
 0x2d7   :  { %4223 = vmatprep.mubr.msk.f32.mxu0 %vm4355_vm4, %v6034_v60  ;;  %4258 = vmatpush3.msra.mxu0 %v2849_v63 }
 0x2d8   :  { %4259 = vmatprep.subr.mxu0 %v6034_v60 }
 0x2d9   :  { %4260 = vmatpush3.msra.mxu0 %v2848_v16 }
 0x2da   :  { %4224 = vmatmul.mubr.msk.f32.gmra.mxu0 %vm2297_vm7, %v2411_v17  ;;  %4264 = vmatprep.subr.mxu0 %v6034_v60 }
 0x2db   :  { %4226 = vmatprep.mubr.msk.f32.mxu0 %vm4355_vm4, %v6034_v60 }
 0x2de   :  { %4227 = vmatmul.mubr.msk.f32.gmra.mxu0 %vm2297_vm7, %v2413_v59 }
 0x2df   :  { %4229 = vmatprep.mubr.msk.f32.mxu0 %vm4355_vm4, %v6034_v60 }
 0x2e2   :  { %4230 = vmatmul.mubr.msk.f32.gmra.mxu0 %vm2297_vm7, %v2415_v34 }
 0x2e3   :  { %4261 = vmatprep.mubr.msk.f32.mxu0 %vm4355_vm4, %v6034_v60 }
 0x354   :  { %v2516_v18 = vpop.f32.mrf.mxu0 }
 0x356   :  { %v4198_v32 = vpop.f32.mrf.mxu0 }
 0x35c   :  { %v2745_v21 = vpop.f32.mrf.mxu1 }
 0x35e   :  { %v4240_v53 = vpop.f32.mrf.mxu1 }
 0x364   :  { %v2521_v33 = vpop.f32.mrf.mxu0 }
 0x366   :  { %v4201_v12 = vpop.f32.mrf.mxu0 }
 0x36c   :  { %v2750_v44 = vpop.f32.mrf.mxu1 }
 0x36e   :  { %v4243_v58 = vpop.f32.mrf.mxu1 }
 0x374   :  { %v2526_v61 = vpop.f32.mrf.mxu0 }
 0x376   :  { %v4204_v47 = vpop.f32.mrf.mxu0 }
 0x37c   :  { %v2755_v9 = vpop.f32.mrf.mxu1 }
 0x37e   :  { %v4246_v22 = vpop.f32.mrf.mxu1 }
 0x384   :  { %v2531_v39 = vpop.f32.mrf.mxu0 }
 0x386   :  { %v4207_v50 = vpop.f32.mrf.mxu0 }
 0x38d   :  { %v2760_v46 = vpop.f32.mrf.mxu1 }
 0x38e   :  { %v2536_v28 = vpop.f32.mrf.mxu0 }
 0x38f   :  { %v4249_v1 = vpop.f32.mrf.mxu1 }
 0x390   :  { %v4210_v57 = vpop.f32.mrf.mxu0 }
 0x391   :  { %v2765_v54 = vpop.f32.mrf.mxu1 }
 0x392   :  { %v2624_v15 = vpop.f32.mrf.mxu0 }
 0x393   :  { %v2625_v48 = vadd.f32 %v2624_v15, %v2516_v18  ;;  %v4252_v8 = vpop.f32.mrf.mxu1  ;;  %v2843_v15 = vld [vmem:[%s6023_s1 + $0xd0] sm:$0xff] }
 0x394   :  { %v4219_v13 = vpop.f32.mrf.mxu0  ;;  %v3003_v8 = vld [vmem:[%s6023_s1 + $0x120] sm:$0xff] }
 0x395   :  { %v2769_v36 = vadd.f32 %v2745_v21, %v2625_v48  ;;  %v2842_v48 = vld [vmem:[%s6023_s1 + $0xc8] sm:$0xff]  ;;  %v3002_v13 = vld [vmem:[%s6023_s1 + $0x118] sm:$0xff] }
 0x396   :  { %v2629_v31 = vpop.f32.mrf.mxu0 }
 0x397   :  { %v2779_v40 = vadd.f32 %v3557_v7, %v2769_v36  ;;  %v2630_v38 = vadd.f32 %v2629_v31, %v2521_v33  ;;  %v3001_v36 = vld [vmem:[%s6023_s1 + $0x110] sm:$0xff]  ;;  %v3000_v31 = vld [vmem:[%s6023_s1 + $0x108] sm:$0xff] }
 0x398   :  { %v4222_v52 = vpop.f32.mrf.mxu0 }
 0x399   :  { %v2784_v37 = vmax.f32 %v2779_v40, 0.0  ;;  %v2770_v6 = vadd.f32 %v2750_v44, %v2630_v38  ;;  %v3163_v40 = vld [vmem:[%s6023_s1 + $0x160] sm:$0xff]  ;;  %v3162_v52 = vld [vmem:[%s6023_s1 + $0x158] sm:$0xff] }
 0x39a   :  { %v2634_v62 = vpop.f32.mrf.mxu0 }
 0x39b   :  { %2790 = vst.msk [vmem:[#allocation4] sm:$0xff] %vm2789_vm9, %v2784_v37  ;;  %v2780_v24 = vadd.f32 %v3557_v7, %v2770_v6  ;;  %v2635_v30 = vadd.f32 %v2634_v62, %v2526_v61  ;;  %v3161_v37 = vld [vmem:[%s6023_s1 + $0x150] sm:$0xff]  ;;  %v3160_v6 = vld [vmem:[%s6023_s1 + $0x148] sm:$0xff] }
 0x39c   :  { %v4225_v49 = vpop.f32.mrf.mxu0 }
 0x39d   :  { %v2785_v19 = vmax.f32 %v2780_v24, 0.0  ;;  %v2771_v35 = vadd.f32 %v2755_v9, %v2635_v30  ;;  %v3271_v24 = vld [vmem:[%s6023_s1 + $0x1a0] sm:$0xff]  ;;  %v3270_v30 = vld [vmem:[%s6023_s1 + $0x198] sm:$0xff]  ;;  %v3269_v49 = vld [vmem:[%s6023_s1 + $0x190] sm:$0xff] }
 0x39e   :  { %v2639_v5 = vpop.f32.mrf.mxu0 }
 0x39f   :  { %2791 = vst.msk [vmem:[#allocation4 + $0x8] sm:$0xff] %vm2789_vm9, %v2785_v19  ;;  %v2781_v10 = vadd.f32 %v3557_v7, %v2771_v35  ;;  %v2640_v56 = vadd.f32 %v2639_v5, %v2531_v39  ;;  %v3268_v19 = vld [vmem:[%s6023_s1 + $0x188] sm:$0xff]  ;;  %v3267_v35 = vld [vmem:[%s6023_s1 + $0x180] sm:$0xff]  ;;  %v3266_v5 = vld [vmem:[%s6023_s1 + $0x178] sm:$0xff] }
 0x3a0   :  { %v4228_v25 = vpop.f32.mrf.mxu0 }
 0x3a1   :  { %v2786_v20 = vmax.f32 %v2781_v10, 0.0  ;;  %v2772_v26 = vadd.f32 %v2760_v46, %v2640_v56  ;;  %v3272_v10 = vld [vmem:[%s6023_s1 + $0x1a8] sm:$0x1]  ;;  %v4356_v56 = vmov 0  }
 0x3a2   :  { %v2644_v4 = vpop.f32.mrf.mxu0  ;;  %4327 = vset.pattern.permute.xlu0 %v4356_v56 }
 0x3a3   :  { %2792 = vst.msk [vmem:[#allocation4 + $0x10] sm:$0xff] %vm2789_vm9, %v2786_v20  ;;  %v2782_v11 = vadd.f32 %v3557_v7, %v2772_v26  ;;  %v2645_v41 = vadd.f32 %v2644_v4, %v2536_v28  ;;  %v2845_v28 = vld [vmem:[%s6023_s1 + $0xe0] sm:$0xff]  ;;  %3275 = vperm.xlu0 %4327, %v3272_v10  }
 0x3a4   :  { %v4231_v3 = vpop.f32.mrf.mxu0 }
 0x3a5   :  { %v2787_v14 = vmax.f32 %v2782_v11, 0.0  ;;  %v2773_v43 = vadd.f32 %v2765_v54, %v2645_v41  ;;  %v2844_v54 = vld [vmem:[%s6023_s1 + $0xd8] sm:$0xff] }
 0x3a6   :  { %v2796_v42 = vld [vmem:[#allocation4] ss:$2 sm:$0xff]  ;;  %v2802_v23 = vld [vmem:[#allocation4 + $0x1] ss:$2 sm:$0xff] }
 0x3a7   :  { %2793 = vst.msk [vmem:[#allocation4 + $0x18] sm:$0xff] %vm2789_vm9, %v2787_v14  ;;  %v2783_v51 = vadd.f32 %v3557_v7, %v2773_v43  ;;  %v2807_v17 = vmax.f32 %v2796_v42, %v2802_v23 }
 0x3a9   :  { %v2788_v59 = vmax.f32 %v2783_v51, 0.0  ;;  %v3563_v51 = vld [vmem:[%s6023_s1 + $0x168] ss:$0 sm:$0xff] }
 0x3aa   :  { %v2811_v34 = vld [vmem:[#allocation4 + $0x2] ss:$2 sm:$0xff]  ;;  %v2820_v27 = vld [vmem:[#allocation4 + $0x3] ss:$2 sm:$0xff] }
 0x3ab   :  { %v2816_v2 = vmax.f32 %v2807_v17, %v2811_v34  ;;  %2795 = vst.msk [vmem:[#allocation4 + $0x20] sm:$0x1f] %vm2794_vm10, %v2788_v59  ;;  %v2829_v45 = vld [vmem:[#allocation4 + $0x4] ss:$2 sm:$0xff] }
 0x3ad   :  { %v2825_v0 = vmax.f32 %v2816_v2, %v2820_v27 }
 0x3ae   :  { %v2798_v55 = vld [vmem:[#allocation4 + $0x10] ss:$2 sm:$0xff]  ;;  %v2804_v16 = vld [vmem:[#allocation4 + $0x11] ss:$2 sm:$0xff] }
 0x3af   :  { %v2834_v63 = vmax.f32 %v2825_v0, %v2829_v45  ;;  %v2808_v29 = vmax.f32 %v2798_v55, %v2804_v16 }
 0x3b1   :  { %2837 = vst.msk [vmem:[#allocation5] sm:$0xff] %vm2789_vm9, %v2834_v63 }
 0x3b2   :  { %v2800_v18 = vld [vmem:[#allocation4 + $0x20] ss:$2 sm:$0x1]  ;;  %v2806_v32 = vld [vmem:[#allocation4 + $0x21] ss:$2 sm:$0x1] }
 0x3b3   :  { %v2809_v21 = vmax.f32 %v2800_v18, %v2806_v32  ;;  %v2813_v53 = vld [vmem:[#allocation4 + $0x12] ss:$2 sm:$0xff]  ;;  %v2815_v33 = vld [vmem:[#allocation4 + $0x22] ss:$2 sm:$0x1] }
 0x3b4   :  { %v2817_v12 = vmax.f32 %v2808_v29, %v2813_v53  ;;  %v2822_v58 = vld [vmem:[#allocation4 + $0x13] ss:$2 sm:$0xff]  ;;  %v2824_v61 = vld [vmem:[#allocation4 + $0x23] ss:$2 sm:$0x1] }
 0x3b5   :  { %v2818_v44 = vmax.f32 %v2809_v21, %v2815_v33  ;;  %v2831_v22 = vld [vmem:[#allocation4 + $0x14] ss:$2 sm:$0xff]  ;;  %v2833_v39 = vld [vmem:[#allocation4 + $0x24] ss:$2 sm:$0x1] }
 0x3b6   :  { %v2826_v47 = vmax.f32 %v2817_v12, %v2822_v58  ;;  %v3260_v32 = vld [vmem:[%s6023_s1 + $0x170] sm:$0x3]  ;;  %s4332_s1 = scalar_lea.vmem %s3367_s14, 16 }
 0x3b7   :  { %v2827_v9 = vmax.f32 %v2818_v44, %v2824_v61  ;;  %p4333_p0 = scmp.ne.s32.totalorder %s3367_s14, %s4332_s1  ;;  %p4338_p2 = scmp.lt.s32.totalorder %s4336_s15, %s4332_s1 }
 0x3b8   :  { %v2835_v50 = vmax.f32 %v2826_v47, %v2831_v22 }
 0x3b9   :  { %v2836_v46 = vmax.f32 %v2827_v9, %v2833_v39  ;;  %p4339_p3 = por %p4338_p2, %p4337_p1 }
 0x3ba   :  { %2838 = vst.msk [vmem:[#allocation5 + $0x8] sm:$0xff] %vm2789_vm9, %v2835_v50 }
 0x3bb   :  { %2840 = vst.msk [vmem:[#allocation5 + $0x10] sm:$0x1] %vm2839_vm11, %v2836_v46  ;;  %p4340_p4 = pnand %p4339_p3, %p4333_p0 }
 0x3c1   :  { %v2847_v1 = vld [vmem:[#allocation5 + $0x1] ss:$2 sm:$0x7f]  ;;  %v2841_v7 = vld [vmem:[#allocation5] ss:$2 sm:$0x7f] }
 0x3c2   :  { %v3079_v57 = vld [vmem:[#allocation5 + $0x3] ss:$2 sm:$0x7f]  ;;  %4262 = vmatmul.mubr.msk.f32.vlgmr.msra.gmra.mxu0 %vm2789_vm9, %v2847_v1  ;;  %v2999_v38 = vld [vmem:[#allocation5 + $0x2] ss:$2 sm:$0x7f] }
 0x3c3   :  { %4295 = vmatmul.mubr.msk.f32.vlgmr.msra.gmra.mxu1 %vm2789_vm9, %v3079_v57  ;;  %4265 = vmatpush3.msra.mxu0 %v2845_v28  ;;  %v3159_v62 = vld [vmem:[#allocation5 + $0x4] ss:$2 sm:$0x7f] }
 0x3c4   :  { %4272 = vmatprep.mubr.msk.f32.mxu0 %vm4355_vm4, %v6034_v60  ;;  %4266 = vmatprep.subr.mxu0 %v6034_v60 }
 0x3c5   :  { %4320 = vmatprep.mubr.msk.f32.mxu1 %vm4355_vm4, %v6034_v60  ;;  %4267 = vmatpush3.msra.mxu0 %v2844_v54 }
 0x3c6   :  { %4268 = vmatprep.subr.mxu0 %v6034_v60  ;;  %4309 = vmatpush3.msra.mxu1 %v3271_v24 }
 0x3c7   :  { %4269 = vmatpush3.msra.mxu0 %v2843_v15  ;;  %4310 = vmatprep.subr.mxu1 %v6034_v60 }
 0x3c8   :  { %4270 = vmatprep.subr.mxu0 %v6034_v60  ;;  %4311 = vmatpush3.msra.mxu1 %v3270_v30 }
 0x3c9   :  { %4271 = vmatpush3.msra.mxu0 %v2842_v48  ;;  %4312 = vmatprep.subr.mxu1 %v6034_v60 }
 0x3ca   :  { %4273 = vmatmul.mubr.msk.f32.vlgmr.msra.gmra.mxu0 %vm2789_vm9, %v2841_v7  ;;  %4275 = vmatprep.subr.mxu0 %v6034_v60 }
 0x3cb   :  { %4276 = vmatpush3.msra.mxu0 %v3003_v8  ;;  %4283 = vmatprep.mubr.msk.f32.mxu0 %vm4355_vm4, %v6034_v60 }
 0x3cc   :  { %4277 = vmatprep.subr.mxu0 %v6034_v60  ;;  %4313 = vmatpush3.msra.mxu1 %v3269_v49 }
 0x3cd   :  { %4278 = vmatpush3.msra.mxu0 %v3002_v13  ;;  %4314 = vmatprep.subr.mxu1 %v6034_v60 }
 0x3ce   :  { %4279 = vmatprep.subr.mxu0 %v6034_v60  ;;  %4315 = vmatpush3.msra.mxu1 %v3268_v19 }
 0x3cf   :  { %4280 = vmatpush3.msra.mxu0 %v3001_v36  ;;  %4316 = vmatprep.subr.mxu1 %v6034_v60 }
 0x3d0   :  { %4281 = vmatprep.subr.mxu0 %v6034_v60  ;;  %4317 = vmatpush3.msra.mxu1 %v3267_v35 }
 0x3d1   :  { %4282 = vmatpush3.msra.mxu0 %v3000_v31  ;;  %4318 = vmatprep.subr.mxu1 %v6034_v60 }
 0x3d2   :  { %4284 = vmatmul.mubr.msk.f32.vlgmr.msra.gmra.mxu0 %vm2789_vm9, %v2999_v38  ;;  %4297 = vmatprep.subr.mxu0 %v6034_v60 }
 0x3d3   :  { %4298 = vmatpush3.msra.mxu0 %v3163_v40  ;;  %4305 = vmatprep.mubr.msk.f32.mxu0 %vm4355_vm4, %v6034_v60 }
 0x3d4   :  { %4299 = vmatprep.subr.mxu0 %v6034_v60  ;;  %4319 = vmatpush3.msra.mxu1 %v3266_v5 }
 0x3d5   :  { %4300 = vmatpush3.msra.mxu0 %v3162_v52 }
 0x3d6   :  { %4301 = vmatprep.subr.mxu0 %v6034_v60 }
 0x3d7   :  { %4302 = vmatpush3.msra.mxu0 %v3161_v37 }
 0x3d8   :  { %4303 = vmatprep.subr.mxu0 %v6034_v60 }
 0x3d9   :  { %4304 = vmatpush3.msra.mxu0 %v3160_v6 }
 0x3da   :  { %4306 = vmatmul.mubr.msk.f32.vlgmr.msra.gmra.mxu0 %vm2789_vm9, %v3159_v62 }
 0x41e   :  { %v3276_v44 = vpop.permute.xlu0 %3275 }
 0x482   :  { %v2921_v25 = vpop.f32.mrf.mxu0 }
 0x483   :  { %v3153_v20 = vpop.f32.mrf.mxu1 }
 0x484   :  { %v4263_v26 = vpop.f32.mrf.mxu0 }
 0x485   :  { %v4296_v4 = vpop.f32.mrf.mxu1 }
 0x48a   :  { %v2994_v11 = vpop.f32.mrf.mxu0 }
 0x48b   :  { %v2995_v14 = vadd.f32 %v2994_v11, %v2921_v25 }
 0x48c   :  { %v4274_v41 = vpop.f32.mrf.mxu0 }
 0x492   :  { %v3073_v3 = vpop.f32.mrf.mxu0 }
 0x493   :  { %v3077_v42 = vadd.f32 %v3073_v3, %v2995_v14 }
 0x494   :  { %v4285_v43 = vpop.f32.mrf.mxu0 }
 0x495   :  { %v3157_v23 = vadd.f32 %v3153_v20, %v3077_v42 }
 0x49a   :  { %v3233_v60 = vpop.f32.mrf.mxu0 }
 0x49b   :  { %v3237_v17 = vadd.f32 %v3233_v60, %v3157_v23 }
 0x49c   :  { %v4307_v59 = vpop.f32.mrf.mxu0 }
 0x49d   :  { %v3243_v34 = vadd.f32 %v3563_v51, %v3237_v17 }
 0x49f   :  { %v3244_v2 = vmax.f32 %v3243_v34, 0.0 }
 0x4a1   :  { %3246 = vst.msk [vmem:[#allocation6] sm:$0x7f] %vm3245_vm12, %v3244_v2 }
 0x4a8   :  { %v3247_v27 = vld [vmem:[#allocation6] ss:$2 sm:$0x3]  ;;  %v3249_v0 = vld [vmem:[#allocation6 + $0x1] ss:$2 sm:$0x3] }
 0x4a9   :  { %v3250_v45 = vmax.f32 %v3247_v27, %v3249_v0  ;;  %v3252_v63 = vld [vmem:[#allocation6 + $0x2] ss:$2 sm:$0x3]  ;;  %v3255_v16 = vld [vmem:[#allocation6 + $0x3] ss:$2 sm:$0x3] }
 0x4aa   :  { %v3258_v18 = vld [vmem:[#allocation6 + $0x4] ss:$2 sm:$0x3] }
 0x4ab   :  { %v3253_v55 = vmax.f32 %v3250_v45, %v3252_v63 }
 0x4ad   :  { %v3256_v29 = vmax.f32 %v3253_v55, %v3255_v16 }
 0x4af   :  { %v3259_v21 = vmax.f32 %v3256_v29, %v3258_v18 }
 0x4b1   :  { %v3261_v53 = vmul.f32 %v3260_v32, %v3259_v21 }
 0x4b3   :  { %v3263_v33 = vrot.slane %v3261_v53, 1 }
 0x4b5   :  { %v3265_v12 = vadd.f32 %v3263_v33, %v3261_v53 }
 0x4b7   :  { %4321 = vmatmul.mubr.msk.f32.vlgmr.msra.gmra.mxu1 %vm3278_vm13, %v3265_v12 }
 0x577   :  { %v3348_v58 = vpop.f32.mrf.mxu1 }
 0x578   :  { %v3349_v61 = vadd.f32 %v3348_v58, %v3276_v44 }
 0x579   :  { %v4322_v47 = vpop.f32.mrf.mxu1 }
 0x57a   :  { %v3352_v9 = vsub.f32 0.0, %v3349_v61 }
 0x57c   :  { %v3353_v22 = vmul.f32 1.442695, %v3352_v9 }
 0x57e   :  { %4328 = vpow2.f32 %v3353_v22 }
 0x58b   :  { %v4329_v39 = vpop.eup %4328 }
 0x58c   :  { %v3355_v50 = vadd.f32 1.0, %v4329_v39 }
 0x58e   :  { %4330 = vrcp.f32 %v3355_v50 }
 0x59b   :  { %v4331_v46 = vpop.eup %4330 }
 0x59c   :  { %3359 = vst.msk [vmem:[#allocation7] sm:$0x1] %vm3358_vm14, %v4331_v46 }
 0x59d   :  { %4343 = shalt.err (!%p4340_p4)
}
 0x59e   :  { %3369 = dma.vmem_to_hbm [thread:$0]  %s3367_s14, 16, %s6024_s2, [#allocation8]  }
 0x59f   :  { %4352 = dma.done.wait [#allocation8], 16  }
 0x5a0   :  { %4353 = vsyncadd [#allocation8], 4294967280 }
 0x5a1   :  { %3373 = vsyncpa [#allocation8], 1 }

</bundles_post_ra>
